<compile_context>
chip_gen: v5e
topology: v5e:2x2
jax: 0.10.0
libtpu: 0.0.40
codegen_flags: <defaults>
</compile_context>

<pallas_src>
import numpy as np
import jax
import jax.numpy as jnp
from jax.experimental import pallas as pl
from jax.experimental.pallas import tpu as pltpu


def _pack_aligned(parts, dtype):
    """Stack 2-D blocks along rows; each block starts at an 8-aligned row (sublane multiple)."""
    ncol = parts[0].shape[1]
    offs, off = [], 0
    for p in parts:
        assert p.ndim == 2 and p.shape[1] == ncol
        offs.append(off)
        off += ((p.shape[0] + 7) // 8) * 8
    buf = jnp.zeros((off, ncol), dtype)
    for p, o in zip(parts, offs):
        buf = buf.at[o:o + p.shape[0], :].set(p.astype(dtype))
    return buf, tuple(offs)


# --------------------------------------------------------------------------------------
# Fused kernel: (pose+projection matmul) + bilinear grid_sample (HW-tiled one-hot matmul)
# + MLPFeature + online-softmax weighted pooling over views + MLPOut.
# --------------------------------------------------------------------------------------
def make_fused_kernel(H_lat, W_lat, C_lat, hidden, d_feat, hidden2, d_out,
                      hw_tile, po_off, b2_off, w3v_off, b3_off, b4_off,
                      compute_dtype, approx_recip):
    HW = H_lat * W_lat
    n_chunks = HW // hw_tile
    cdt = compute_dtype

    def kernel(pd_ref, pose_ref, lat_ref, w1p_ref, w2p_ref, w3p_ref, w4p_ref,
               out_ref, m_scr, s_scr, sf_scr, sff_scr):
        rn = pl.program_id(2)

        pd = pd_ref[0]                    # (rb, 8)  [xyz(3) | dirs(3) | 1 | 0]  f32
        rb = pd.shape[0]
        M = pose_ref[0]                   # (8, 16)  folded w2c rot/trans + projection + 1-col

        # One MXU op: xyz_cam (0:3), u*z (3), v*z (4), dirs_cam (5:8), const 1 (8).
        cam = jnp.dot(pd, M, preferred_element_type=jnp.float32)          # (rb, 16) f32
        z = cam[:, 2:3]
        ix = jnp.clip(cam[:, 3:4] / z, 0.0, float(W_lat - 1))             # padding="border"
        iy = jnp.clip(cam[:, 4:5] / z, 0.0, float(H_lat - 1))

        x0 = jnp.floor(ix)
        y0 = jnp.floor(iy)
        wx1 = ix - x0
        wx0 = 1.0 - wx1
        wy1 = iy - y0
        wy0 = 1.0 - wy1
        x0i = x0.astype(jnp.int32)
        y0i = y0.astype(jnp.int32)
        x1i = jnp.minimum(x0i + 1, W_lat - 1)
        y1i = jnp.minimum(y0i + 1, H_lat - 1)

        fy0 = y0i * W_lat
        fy1 = y1i * W_lat
        f00 = fy0 + x0i
        f01 = fy0 + x1i
        f10 = fy1 + x0i
        f11 = fy1 + x1i
        w00 = wy0 * wx0
        w01 = wy0 * wx1
        w10 = wy1 * wx0
        w11 = wy1 * wx1

        # bilinear grid_sample as an HW-tiled one-hot matmul; iota hoisted out of the loop.
        col = jax.lax.broadcasted_iota(jnp.int32, (rb, hw_tile), 1)
        lat_samp = jnp.zeros((rb, C_lat), jnp.float32)
        for ci in range(n_chunks):
            off = ci * hw_tile
            # chained selects (last write wins); ordering is exact at clamped-border collisions
            w = jnp.where(col == f11 - off, w11, 0.0)
            w = jnp.where(col == f10 - off, w10, w)
            w = jnp.where(col == f01 - off, w01, w)
            w = jnp.where(col == f00 - off, w00, w)
            lat_samp = lat_samp + jnp.dot(
                w.astype(cdt), lat_ref[0, off:off + hw_tile, :],
                preferred_element_type=jnp.float32)

        # MLPFeature layer 1: latent part + pose part (xyz/dir weights and bias folded into the
        # 16-wide cam operand) -> ReLU.  Two MXU launches total.
        h = (jnp.dot(lat_samp.astype(cdt), w1p_ref[0:C_lat, :],
                     preferred_element_type=jnp.float32)
             + jnp.dot(cam.astype(cdt), w1p_ref[po_off:po_off + 16, :],
                       preferred_element_type=jnp.float32))
        h = jnp.maximum(h, 0.0)

        # MLPFeature layer 2: fused (feature | weight-logit) head, 8-aligned bias row.
        fw = (jnp.dot(h.astype(cdt), w2p_ref[0:hidden, :],
                      preferred_element_type=jnp.float32)
              + w2p_ref[b2_off:b2_off + 1, :])                            # (rb, d_feat + 1)
        feat = fw[:, 0:d_feat]
        wt = fw[:, d_feat:d_feat + 1]

        # ---- online softmax-weighted pooling over reference views (f32 accumulators) ----
        @pl.when(rn == 0)
        def _():
            m_scr[...] = jnp.full(m_scr.shape, -jnp.inf, jnp.float32)
            s_scr[...] = jnp.zeros(s_scr.shape, jnp.float32)
            sf_scr[...] = jnp.zeros(sf_scr.shape, jnp.float32)
            sff_scr[...] = jnp.zeros(sff_scr.shape, jnp.float32)

        m_old = m_scr[...]
        m_new = jnp.maximum(m_old, wt)
        alpha = jnp.exp(m_old - m_new)
        e = jnp.exp(wt - m_new)
        s_scr[...] = alpha * s_scr[...] + e
        sf_scr[...] = alpha * sf_scr[...] + e * feat
        sff_scr[...] = alpha * sff_scr[...] + e * (feat * feat)
        m_scr[...] = m_new

        # ---- finalize: weighted mean/var + MLPOut on the last view ----
        @pl.when(rn == pl.num_programs(2) - 1)
        def _():
            inv = pl.reciprocal(s_scr[...], approx=approx_recip)
            mean = sf_scr[...] * inv
            var = jnp.maximum(sff_scr[...] * inv - mean * mean, 0.0)
            h2 = (jnp.dot(mean.astype(cdt), w3p_ref[0:d_feat, :],
                          preferred_element_type=jnp.float32)
                  + jnp.dot(var.astype(cdt), w3p_ref[w3v_off:w3v_off + d_feat, :],
                            preferred_element_type=jnp.float32)
                  + w3p_ref[b3_off:b3_off + 1, :])
            h2 = jnp.maximum(h2, 0.0)
            out = (jnp.dot(h2.astype(cdt), w4p_ref[0:hidden2, :],
                           preferred_element_type=jnp.float32)
                   + w4p_ref[b4_off:b4_off + 1, :])
            out_ref[0] = out

    return kernel


# --------------------------------------------------------------------------------------
# Wrapper: layout plumbing (pose/proj/bias folding, latent flatten+cast, aligned weight
# packing, tile selection, vmem budgeting) + pallas_call.
# --------------------------------------------------------------------------------------
def network_forward(xyz, viewdirs, params, cfg):
    ON, RB, _ = xyz.shape
    RN = cfg["RN"]
    C_lat, H_lat, W_lat = cfg["C_lat"], cfg["H_lat"], cfg["W_lat"]
    H_img, W_img = cfg["H_img"], cfg["W_img"]
    hidden, d_feat = cfg["hidden"], cfg["d_feat"]
    hidden2, d_out = cfg["hidden2"], cfg["d_out"]
    cdt = cfg.get("compute_dtype", jnp.bfloat16)
    HW = H_lat * W_lat
    V = ON * RN

    # ray tile: largest of 512/256/128 dividing RB (cuts NT-fold latent re-streaming)
    rb_block = cfg.get("rb_block")
    if rb_block is None:
        rb_block = RB
        for cand in (512, 256, 128):
            if RB % cand == 0:
                rb_block = cand
                break
    assert RB % rb_block == 0
    NT = RB // rb_block

    # HW chunk for the grid-sample one-hot matmul (bounds the (rb, HW) temporary)
    hw_tile = cfg.get("hw_tile")
    if hw_tile is None:
        hw_tile = HW
        for cand in (512, 256):
            if HW > cand and HW % cand == 0:
                hw_tile = cand
                break
    assert HW % hw_tile == 0

    rot = params["rot_w2c"]                     # (V, 3, 3) world->cam rotation
    trans = params["trans_w2c"]                 # (V, 3)
    focal = params["focal"]                     # (ON or 1, 2)
    cpp = params["c"]                           # (ON or 1, 2)
    latent = params["latent"]                   # (V, C, Hl, Wl)

    Rt = jnp.swapaxes(rot, 1, 2)                # xyz @ Rt == rot @ xyz
    if focal.shape[0] == 1:
        focal_v = jnp.broadcast_to(focal, (V, 2))
        c_v = jnp.broadcast_to(cpp, (V, 2))
    else:
        focal_v = jnp.repeat(focal, RN, axis=0)
        c_v = jnp.repeat(cpp, RN, axis=0)

    # fold latent_scaling/image_shape/align_corners:  ix = (x/z)*fx*Wl/Wimg + cx*Wl/Wimg
    sx = W_lat / W_img
    sy = H_lat / H_img
    fx = focal_v[:, 0] * sx
    fy = focal_v[:, 1] * sy
    cx = c_v[:, 0] * sx
    cy = c_v[:, 1] * sy

    # Per-view (8,16) folded transform: [xyz|dirs|1|0] @ M -> [xyz_cam, u*z, v*z, dirs_cam, 1]
    pose_ext = jnp.zeros((V, 8, 16), jnp.float32)
    pose_ext = pose_ext.at[:, 0:3, 0:3].set(Rt.astype(jnp.float32))
    pose_ext = pose_ext.at[:, 0:3, 3].set(fx[:, None] * Rt[:, :, 0] + cx[:, None] * Rt[:, :, 2])
    pose_ext = pose_ext.at[:, 0:3, 4].set(fy[:, None] * Rt[:, :, 1] + cy[:, None] * Rt[:, :, 2])
    pose_ext = pose_ext.at[:, 3:6, 5:8].set(Rt.astype(jnp.float32))
    pose_ext = pose_ext.at[:, 6, 0:3].set(trans.astype(jnp.float32))
    pose_ext = pose_ext.at[:, 6, 3].set(fx * trans[:, 0] + cx * trans[:, 2])
    pose_ext = pose_ext.at[:, 6, 4].set(fy * trans[:, 1] + cy * trans[:, 2])
    pose_ext = pose_ext.at[:, 6, 8].set(1.0)

    # pack xyz + viewdirs + constant-1 column into a single (rb, 8) operand (one DMA stream)
    pd = jnp.zeros((ON, RB, 8), jnp.float32)
    pd = pd.at[..., 0:3].set(xyz.astype(jnp.float32))
    pd = pd.at[..., 3:6].set(viewdirs.astype(jnp.float32))
    pd = pd.at[..., 6].set(1.0)

    lat_flat = jnp.transpose(latent, (0, 2, 3, 1)).reshape(V, HW, C_lat).astype(cdt)

    # packed weights (compute_dtype), each sub-block 8-row aligned; bias-1 folded into layer 1
    w1 = params["w1"]
    wp16 = jnp.zeros((16, hidden), jnp.float32)
    wp16 = wp16.at[0:3].set(w1[C_lat:C_lat + 3])          # xyz_cam weights
    wp16 = wp16.at[5:8].set(w1[C_lat + 3:C_lat + 6])       # dirs_cam weights
    wp16 = wp16.at[8].set(params["b1"])                    # bias (cam col 8 == 1)
    w1p, (_, po_off) = _pack_aligned([w1[0:C_lat], wp16], cdt)
    w2p, (_, b2_off) = _pack_aligned([params["w2"], params["b2"][None, :]], cdt)
    w3p, (_, w3v_off, b3_off) = _pack_aligned(
        [params["w3"][0:d_feat], params["w3"][d_feat:2 * d_feat], params["b3"][None, :]], cdt)
    w4p, (_, b4_off) = _pack_aligned([params["w4"], params["b4"][None, :]], cdt)

    # explicit VMEM budget from the chosen tiles (+ temporaries + headroom)
    csz = np.dtype(cdt).itemsize
    est = 0
    est += 2 * rb_block * 8 * 4                                       # pd (double-buffered)
    est += 2 * 8 * 16 * 4                                             # pose
    est += 2 * HW * C_lat * csz                                       # latent block x2
    est += 2 * rb_block * d_out * 4                                   # out
    est += 2 * sum(int(np.prod(w.shape)) for w in (w1p, w2p, w3p, w4p)) * csz
    est += rb_block * (2 + 2 * d_feat) * 4                            # softmax accumulators
    est += 2 * rb_block * hw_tile * (4 + csz)                         # one-hot temporaries
    est += rb_block * (C_lat + hidden + hidden2 + 4 * d_feat + 64) * 4
    vmem_limit = int(min(max(2 * est, 16 * 1024 * 1024), 96 * 1024 * 1024))

    kernel = make_fused_kernel(H_lat, W_lat, C_lat, hidden, d_feat, hidden2, d_out,
                               hw_tile, po_off, b2_off, w3v_off, b3_off, b4_off,
                               cdt, approx_recip=(cdt != jnp.float32))

    def _run(weight_mode):
        def wspec(arr):
            if weight_mode is None:
                return pl.BlockSpec(arr.shape, lambda o, r, v: (0, 0))
            return pl.BlockSpec(arr.shape, lambda o, r, v: (0, 0), pipeline_mode=weight_mode)

        grid_spec = pltpu.PrefetchScalarGridSpec(
            num_scalar_prefetch=0,
            grid=(ON, NT, RN),
            in_specs=[
                pl.BlockSpec((1, rb_block, 8), lambda o, r, v: (o, r, 0)),         # xyz|dirs|1
                pl.BlockSpec((1, 8, 16), lambda o, r, v: (o * RN + v, 0, 0)),      # folded pose
                pl.BlockSpec((1, HW, C_lat), lambda o, r, v: (o * RN + v, 0, 0)),  # latent
                wspec(w1p), wspec(w2p), wspec(w3p), wspec(w4p),
            ],
            out_specs=pl.BlockSpec((1, rb_block, d_out), lambda o, r, v: (o, r, 0)),
            scratch_shapes=[
                pltpu.VMEM((rb_block, 1), jnp.float32),        # running max of weight logits
                pltpu.VMEM((rb_block, 1), jnp.float32),        # running sum exp
                pltpu.VMEM((rb_block, d_feat), jnp.float32),   # running sum e*f
                pltpu.VMEM((rb_block, d_feat), jnp.float32),   # running sum e*f^2
            ],
        )
        return pl.pallas_call(
            kernel,
            out_shape=jax.ShapeDtypeStruct((ON, RB, d_out), jnp.float32),
            grid_spec=grid_spec,
            compiler_params=pltpu.CompilerParams(
                dimension_semantics=("parallel", "parallel", "arbitrary"),
                vmem_limit_bytes=vmem_limit),
        )(pd, pose_ext, lat_flat, w1p, w2p, w3p, w4p)

    # Single-buffer the grid-invariant weight blocks; fall back to default double-buffering
    # if this Pallas build rejects buffer_count=1.
    try:
        buffered_one = pl.Buffered(1)
    except Exception:
        buffered_one = None
    try:
        return jax.block_until_ready(_run(buffered_one))
    except Exception:
        if buffered_one is None:
            raise
        return _run(None)


# --------------------------------------------------------------------------------------
# Pure-JAX reference (mirrors the PyTorch forward math) for the correctness check.
# --------------------------------------------------------------------------------------
def reference_forward(xyz, viewdirs, params, cfg):
    ON, RB, _ = xyz.shape
    RN = cfg["RN"]
    C_lat, H_lat, W_lat = cfg["C_lat"], cfg["H_lat"], cfg["W_lat"]
    H_img, W_img = cfg["H_img"], cfg["W_img"]
    d_feat = cfg["d_feat"]
    HW = H_lat * W_lat
    V = ON * RN

    rot = params["rot_w2c"]
    trans = params["trans_w2c"]
    focal = params["focal"]
    cpp = params["c"]
    lat_flat = jnp.transpose(params["latent"], (0, 2, 3, 1)).reshape(V, HW, C_lat)

    xyz_rep = jnp.repeat(xyz, RN, axis=0)
    dirs_rep = jnp.repeat(viewdirs, RN, axis=0)
    xyz_cam = jnp.einsum('vij,vrj->vri', rot, xyz_rep) + trans[:, None, :]
    dirs_cam = jnp.einsum('vij,vrj->vri', rot, dirs_rep)

    if focal.shape[0] == 1:
        focal_v = jnp.broadcast_to(focal, (V, 2))
        c_v = jnp.broadcast_to(cpp, (V, 2))
    else:
        focal_v = jnp.repeat(focal, RN, axis=0)
        c_v = jnp.repeat(cpp, RN, axis=0)

    uv = xyz_cam[..., :2] / xyz_cam[..., 2:3]
    uv = uv * focal_v[:, None, :] + c_v[:, None, :]
    scale_x = (W_lat / (W_lat - 1)) / W_img
    scale_y = (H_lat / (H_lat - 1)) / H_img
    gx = 2.0 * uv[..., 0] * scale_x - 1.0
    gy = 2.0 * uv[..., 1] * scale_y - 1.0
    ix = jnp.clip((gx + 1.0) * 0.5 * (W_lat - 1), 0.0, W_lat - 1)
    iy = jnp.clip((gy + 1.0) * 0.5 * (H_lat - 1), 0.0, H_lat - 1)
    x0 = jnp.floor(ix); y0 = jnp.floor(iy)
    wx1 = ix - x0; wx0 = 1.0 - wx1
    wy1 = iy - y0; wy0 = 1.0 - wy1
    x0i = x0.astype(jnp.int32); x1i = jnp.clip(x0i + 1, 0, W_lat - 1)
    y0i = y0.astype(jnp.int32); y1i = jnp.clip(y0i + 1, 0, H_lat - 1)

    def gather(yi, xi):
        idx = yi * W_lat + xi
        return jnp.take_along_axis(lat_flat, idx[..., None], axis=1)

    samp = (wy0[..., None] * (wx0[..., None] * gather(y0i, x0i)
                              + wx1[..., None] * gather(y0i, x1i))
            + wy1[..., None] * (wx0[..., None] * gather(y1i, x0i)
                                + wx1[..., None] * gather(y1i, x1i)))

    pf = jnp.concatenate([samp, xyz_cam, dirs_cam], axis=-1)
    h = jnp.maximum(pf @ params["w1"] + params["b1"], 0.0)
    fw = h @ params["w2"] + params["b2"]
    feat = fw[..., :d_feat].reshape(ON, RN, RB, d_feat)
    wt = fw[..., d_feat:].reshape(ON, RN, RB, 1)
    w = jax.nn.softmax(wt, axis=1)
    mean = jnp.sum(w * feat, axis=1)
    var = jnp.sum(w * (feat - mean[:, None]) ** 2, axis=1)
    h2 = jnp.maximum(jnp.concatenate([mean, var], axis=-1) @ params["w3"] + params["b3"], 0.0)
    return h2 @ params["w4"] + params["b4"]


if __name__ == "__main__":
    ON, RN, RB = 2, 3, 8
    C_lat, H_lat, W_lat = 32, 8, 8
    H_img, W_img = 32, 32
    hidden, d_feat, hidden2, d_out = 32, 16, 32, 4
    cfg = dict(RN=RN, C_lat=C_lat, H_lat=H_lat, W_lat=W_lat, H_img=H_img, W_img=W_img,
               hidden=hidden, d_feat=d_feat, hidden2=hidden2, d_out=d_out)
    V = ON * RN

    key = jax.random.PRNGKey(0)
    ks = jax.random.split(key, 12)

    # surface points in front of the cameras + unit view directions
    xyz = jnp.concatenate(
        [jax.random.uniform(ks[0], (ON, RB, 2), minval=-0.5, maxval=0.5),
         jax.random.uniform(ks[1], (ON, RB, 1), minval=2.0, maxval=4.0)],
        axis=-1).astype(jnp.float32)
    viewdirs = jax.random.normal(ks[2], (ON, RB, 3), dtype=jnp.float32)
    viewdirs = viewdirs / jnp.linalg.norm(viewdirs, axis=-1, keepdims=True)

    # deterministic camera-to-world poses, converted to world->cam as Network.encode() does
    poses_c2w = np.tile(np.eye(4, dtype=np.float32), (V, 1, 1))
    for v in range(V):
        th = 0.05 * v
        c_, s_ = np.cos(th), np.sin(th)
        poses_c2w[v, :3, :3] = np.array([[c_, -s_, 0.0], [s_, c_, 0.0], [0.0, 0.0, 1.0]],
                                        dtype=np.float32)
        poses_c2w[v, :3, 3] = np.array([0.05 * v, -0.03 * v, 0.0], dtype=np.float32)
    poses_c2w = jnp.asarray(poses_c2w)
    rot_w2c = jnp.swapaxes(poses_c2w[:, :3, :3], 1, 2)
    trans_w2c = -jnp.einsum('vij,vj->vi', rot_w2c, poses_c2w[:, :3, 3])

    focal = jnp.array([[30.0, 30.0], [28.0, 28.0]], dtype=jnp.float32)   # (ON, 2)
    c_pp = jnp.full((ON, 2), 16.0, dtype=jnp.float32)

    # TODO(synk): Encoder CNN is not specified — use a synthetic latent feature map.
    latent = 0.5 * jax.random.normal(ks[3], (V, C_lat, H_lat, W_lat), dtype=jnp.float32)

    w1 = 0.2 * jax.random.normal(ks[4], (C_lat + 6, hidden), dtype=jnp.float32)
    b1 = 0.1 * jax.random.normal(ks[5], (hidden,), dtype=jnp.float32)
    w2 = 0.2 * jax.random.normal(ks[6], (hidden, d_feat + 1), dtype=jnp.float32)
    b2 = 0.1 * jax.random.normal(ks[7], (d_feat + 1,), dtype=jnp.float32)
    w3 = 0.2 * jax.random.normal(ks[8], (2 * d_feat, hidden2), dtype=jnp.float32)
    b3 = 0.1 * jax.random.normal(ks[9], (hidden2,), dtype=jnp.float32)
    w4 = 0.2 * jax.random.normal(ks[10], (hidden2, d_out), dtype=jnp.float32)
    b4 = 0.1 * jax.random.normal(ks[11], (d_out,), dtype=jnp.float32)

    params = dict(rot_w2c=rot_w2c, trans_w2c=trans_w2c, focal=focal, c=c_pp, latent=latent,
                  w1=w1, b1=b1, w2=w2, b2=b2, w3=w3, b3=b3, w4=w4, b4=b4)

    ref = jax.block_until_ready(reference_forward(xyz, viewdirs, params, cfg))

    # f32 path: tight tolerance (same math, exact reciprocal).
    out_f32 = jax.block_until_ready(
        network_forward(xyz, viewdirs, params, dict(cfg, compute_dtype=jnp.float32)))
    assert out_f32.shape == (ON, RB, d_out)
    assert np.allclose(np.asarray(out_f32), np.asarray(ref), rtol=2e-3, atol=2e-3), \
        "Pallas f32 output mismatch vs JAX reference"

    # bf16 MXU-operand path (production default): tolerance loosened for bf16 operand rounding
    # (accumulation stays f32; softmax accumulators stay f32).
    out_bf16 = jax.block_until_ready(
        network_forward(xyz, viewdirs, params, dict(cfg, compute_dtype=jnp.bfloat16)))
    assert out_bf16.shape == (ON, RB, d_out)
    assert np.allclose(np.asarray(out_bf16), np.asarray(ref), rtol=7e-2, atol=7e-2), \
        "Pallas bf16 output mismatch vs JAX reference"

    print("KERNEL_OK")
</pallas_src>

<mosaic_0001>
module attributes {stable_mosaic.version = 11 : i64} {
  func.func @kernel(%arg0: i32, %arg1: i32, %arg2: i32, %arg3: memref<1x8x8xf32, #tpu.memory_space<vmem>>, %arg4: memref<1x8x16xf32, #tpu.memory_space<vmem>>, %arg5: memref<1x64x32xf32, #tpu.memory_space<vmem>>, %arg6: memref<48x32xf32, #tpu.memory_space<vmem>>, %arg7: memref<40x17xf32, #tpu.memory_space<vmem>>, %arg8: memref<40x32xf32, #tpu.memory_space<vmem>>, %arg9: memref<40x4xf32, #tpu.memory_space<vmem>>, %arg10: memref<1x8x4xf32, #tpu.memory_space<vmem>>, %arg11: memref<8x1xf32, #tpu.memory_space<vmem>>, %arg12: memref<8x1xf32, #tpu.memory_space<vmem>>, %arg13: memref<8x16xf32, #tpu.memory_space<vmem>>, %arg14: memref<8x16xf32, #tpu.memory_space<vmem>>) attributes {dimension_semantics = [#tpu.dimension_semantics<parallel>, #tpu.dimension_semantics<parallel>, #tpu.dimension_semantics<arbitrary>], iteration_bounds = array<i64: 2, 1, 3>, scalar_prefetch = 0 : i64, scratch_operands = 4 : i64, tpu.core_type = #tpu.core_type<tc>, window_params = [{transform_indices = @transform_0, window_bounds = array<i64: 1, 8, 8>}, {transform_indices = @transform_1, window_bounds = array<i64: 1, 8, 16>}, {transform_indices = @transform_2, window_bounds = array<i64: 1, 64, 32>}, {pipeline_mode = #tpu.pipeline_mode<synchronous>, transform_indices = @transform_3, window_bounds = array<i64: 48, 32>}, {pipeline_mode = #tpu.pipeline_mode<synchronous>, transform_indices = @transform_4, window_bounds = array<i64: 40, 17>}, {pipeline_mode = #tpu.pipeline_mode<synchronous>, transform_indices = @transform_5, window_bounds = array<i64: 40, 32>}, {pipeline_mode = #tpu.pipeline_mode<synchronous>, transform_indices = @transform_6, window_bounds = array<i64: 40, 4>}, {transform_indices = @transform_7, window_bounds = array<i64: 1, 8, 4>}]} {
    %c0 = arith.constant 0 : index
    %c0_0 = arith.constant 0 : index
    %c0_1 = arith.constant 0 : index
    %0 = vector.load %arg3[%c0, %c0_0, %c0_1] : memref<1x8x8xf32, #tpu.memory_space<vmem>>, vector<1x8x8xf32>
    %1 = vector.shape_cast %0 : vector<1x8x8xf32> to vector<8x8xf32>
    %c0_2 = arith.constant 0 : index
    %c0_3 = arith.constant 0 : index
    %c0_4 = arith.constant 0 : index
    %2 = vector.load %arg4[%c0_2, %c0_3, %c0_4] : memref<1x8x16xf32, #tpu.memory_space<vmem>>, vector<1x8x16xf32>
    %3 = vector.shape_cast %2 : vector<1x8x16xf32> to vector<8x16xf32>
    %cst = arith.constant dense<0.000000e+00> : vector<8x16xf32>
    %4 = tpu.matmul %1, %3, %cst {dimension_numbers = #tpu.dot_dimension_numbers<[1], [0], [0], [1], [0, 0, 1, 1], [], []>} : vector<8x8xf32>, vector<8x16xf32>, vector<8x16xf32> -> vector<8x16xf32>
    %5 = vector.extract_strided_slice %4 {offsets = [0, 2], sizes = [8, 1], strides = [1, 1]} : vector<8x16xf32> to vector<8x1xf32>
    %6 = vector.extract_strided_slice %4 {offsets = [0, 3], sizes = [8, 1], strides = [1, 1]} : vector<8x16xf32> to vector<8x1xf32>
    %7 = arith.divf %6, %5 : vector<8x1xf32>
    %cst_5 = arith.constant 0.000000e+00 : f32
    %cst_6 = arith.constant 7.000000e+00 : f32
    %8 = vector.broadcast %cst_5 : f32 to vector<8x1xf32>
    %9 = arith.maximumf %8, %7 : vector<8x1xf32>
    %10 = vector.broadcast %cst_6 : f32 to vector<8x1xf32>
    %11 = arith.minimumf %10, %9 : vector<8x1xf32>
    %12 = vector.extract_strided_slice %4 {offsets = [0, 4], sizes = [8, 1], strides = [1, 1]} : vector<8x16xf32> to vector<8x1xf32>
    %13 = arith.divf %12, %5 : vector<8x1xf32>
    %cst_7 = arith.constant 0.000000e+00 : f32
    %cst_8 = arith.constant 7.000000e+00 : f32
    %14 = vector.broadcast %cst_7 : f32 to vector<8x1xf32>
    %15 = arith.maximumf %14, %13 : vector<8x1xf32>
    %16 = vector.broadcast %cst_8 : f32 to vector<8x1xf32>
    %17 = arith.minimumf %16, %15 : vector<8x1xf32>
    %18 = math.floor %11 : vector<8x1xf32>
    %19 = math.floor %17 : vector<8x1xf32>
    %20 = arith.subf %11, %18 : vector<8x1xf32>
    %cst_9 = arith.constant 1.000000e+00 : f32
    %21 = vector.broadcast %cst_9 : f32 to vector<8x1xf32>
    %22 = arith.subf %21, %20 : vector<8x1xf32>
    %23 = arith.subf %17, %19 : vector<8x1xf32>
    %cst_10 = arith.constant 1.000000e+00 : f32
    %24 = vector.broadcast %cst_10 : f32 to vector<8x1xf32>
    %25 = arith.subf %24, %23 : vector<8x1xf32>
    %26 = arith.fptosi %18 : vector<8x1xf32> to vector<8x1xi32>
    %27 = arith.fptosi %19 : vector<8x1xf32> to vector<8x1xi32>
    %c1_i32 = arith.constant 1 : i32
    %28 = vector.broadcast %c1_i32 : i32 to vector<8x1xi32>
    %29 = arith.addi %26, %28 : vector<8x1xi32>
    %c7_i32 = arith.constant 7 : i32
    %30 = vector.broadcast %c7_i32 : i32 to vector<8x1xi32>
    %31 = arith.minsi %29, %30 : vector<8x1xi32>
    %c1_i32_11 = arith.constant 1 : i32
    %32 = vector.broadcast %c1_i32_11 : i32 to vector<8x1xi32>
    %33 = arith.addi %27, %32 : vector<8x1xi32>
    %c7_i32_12 = arith.constant 7 : i32
    %34 = vector.broadcast %c7_i32_12 : i32 to vector<8x1xi32>
    %35 = arith.minsi %33, %34 : vector<8x1xi32>
    %c8_i32 = arith.constant 8 : i32
    %36 = vector.broadcast %c8_i32 : i32 to vector<8x1xi32>
    %37 = arith.muli %27, %36 : vector<8x1xi32>
    %c8_i32_13 = arith.constant 8 : i32
    %38 = vector.broadcast %c8_i32_13 : i32 to vector<8x1xi32>
    %39 = arith.muli %35, %38 : vector<8x1xi32>
    %40 = arith.addi %37, %26 : vector<8x1xi32>
    %41 = arith.addi %37, %31 : vector<8x1xi32>
    %42 = arith.addi %39, %26 : vector<8x1xi32>
    %43 = arith.addi %39, %31 : vector<8x1xi32>
    %44 = arith.mulf %25, %22 : vector<8x1xf32>
    %45 = arith.mulf %25, %20 : vector<8x1xf32>
    %46 = arith.mulf %23, %22 : vector<8x1xf32>
    %47 = arith.mulf %23, %20 : vector<8x1xf32>
    %48 = tpu.iota {dimensions = array<i32: 1>} : vector<8x64xi32>
    %cst_14 = arith.constant 0.000000e+00 : f32
    %49 = vector.broadcast %cst_14 : f32 to vector<8x32xf32>
    %c0_i32 = arith.constant 0 : i32
    %50 = vector.broadcast %c0_i32 : i32 to vector<8x1xi32>
    %51 = arith.subi %43, %50 : vector<8x1xi32>
    %52 = vector.broadcast %51 : vector<8x1xi32> to vector<8x64xi32>
    %53 = arith.cmpi eq, %48, %52 : vector<8x64xi32>
    %cst_15 = arith.constant 0.000000e+00 : f32
    %54 = vector.shape_cast %47 : vector<8x1xf32> to vector<8x1xf32>
    %55 = vector.broadcast %54 : vector<8x1xf32> to vector<8x64xf32>
    %56 = vector.broadcast %cst_15 : f32 to vector<8x64xf32>
    %57 = arith.select %53, %55, %56 : vector<8x64xi1>, vector<8x64xf32>
    %c0_i32_16 = arith.constant 0 : i32
    %58 = vector.broadcast %c0_i32_16 : i32 to vector<8x1xi32>
    %59 = arith.subi %42, %58 : vector<8x1xi32>
    %60 = vector.broadcast %59 : vector<8x1xi32> to vector<8x64xi32>
    %61 = arith.cmpi eq, %48, %60 : vector<8x64xi32>
    %62 = vector.shape_cast %46 : vector<8x1xf32> to vector<8x1xf32>
    %63 = vector.broadcast %62 : vector<8x1xf32> to vector<8x64xf32>
    %64 = arith.select %61, %63, %57 : vector<8x64xi1>, vector<8x64xf32>
    %c0_i32_17 = arith.constant 0 : i32
    %65 = vector.broadcast %c0_i32_17 : i32 to vector<8x1xi32>
    %66 = arith.subi %41, %65 : vector<8x1xi32>
    %67 = vector.broadcast %66 : vector<8x1xi32> to vector<8x64xi32>
    %68 = arith.cmpi eq, %48, %67 : vector<8x64xi32>
    %69 = vector.shape_cast %45 : vector<8x1xf32> to vector<8x1xf32>
    %70 = vector.broadcast %69 : vector<8x1xf32> to vector<8x64xf32>
    %71 = arith.select %68, %70, %64 : vector<8x64xi1>, vector<8x64xf32>
    %c0_i32_18 = arith.constant 0 : i32
    %72 = vector.broadcast %c0_i32_18 : i32 to vector<8x1xi32>
    %73 = arith.subi %40, %72 : vector<8x1xi32>
    %74 = vector.broadcast %73 : vector<8x1xi32> to vector<8x64xi32>
    %75 = arith.cmpi eq, %48, %74 : vector<8x64xi32>
    %76 = vector.shape_cast %44 : vector<8x1xf32> to vector<8x1xf32>
    %77 = vector.broadcast %76 : vector<8x1xf32> to vector<8x64xf32>
    %78 = arith.select %75, %77, %71 : vector<8x64xi1>, vector<8x64xf32>
    %c0_19 = arith.constant 0 : index
    %c0_20 = arith.constant 0 : index
    %c0_21 = arith.constant 0 : index
    %79 = vector.load %arg5[%c0_19, %c0_20, %c0_21] : memref<1x64x32xf32, #tpu.memory_space<vmem>>, vector<1x64x32xf32>
    %80 = vector.shape_cast %79 : vector<1x64x32xf32> to vector<64x32xf32>
    %cst_22 = arith.constant dense<0.000000e+00> : vector<8x32xf32>
    %81 = tpu.matmul %78, %80, %cst_22 {dimension_numbers = #tpu.dot_dimension_numbers<[1], [0], [0], [1], [0, 0, 1, 1], [], []>} : vector<8x64xf32>, vector<64x32xf32>, vector<8x32xf32> -> vector<8x32xf32>
    %82 = arith.addf %49, %81 : vector<8x32xf32>
    %c0_23 = arith.constant 0 : index
    %c0_24 = arith.constant 0 : index
    %83 = vector.load %arg6[%c0_23, %c0_24] : memref<48x32xf32, #tpu.memory_space<vmem>>, vector<32x32xf32>
    %cst_25 = arith.constant dense<0.000000e+00> : vector<8x32xf32>
    %84 = tpu.matmul %82, %83, %cst_25 {dimension_numbers = #tpu.dot_dimension_numbers<[1], [0], [0], [1], [0, 0, 1, 1], [], []>} : vector<8x32xf32>, vector<32x32xf32>, vector<8x32xf32> -> vector<8x32xf32>
    %c32 = arith.constant 32 : index
    %c0_26 = arith.constant 0 : index
    %85 = vector.load %arg6[%c32, %c0_26] : memref<48x32xf32, #tpu.memory_space<vmem>>, vector<16x32xf32>
    %cst_27 = arith.constant dense<0.000000e+00> : vector<8x32xf32>
    %86 = tpu.matmul %4, %85, %cst_27 {dimension_numbers = #tpu.dot_dimension_numbers<[1], [0], [0], [1], [0, 0, 1, 1], [], []>} : vector<8x16xf32>, vector<16x32xf32>, vector<8x32xf32> -> vector<8x32xf32>
    %87 = arith.addf %84, %86 : vector<8x32xf32>
    %cst_28 = arith.constant 0.000000e+00 : f32
    %88 = vector.broadcast %cst_28 : f32 to vector<8x32xf32>
    %89 = arith.maximumf %87, %88 : vector<8x32xf32>
    %c0_29 = arith.constant 0 : index
    %c0_30 = arith.constant 0 : index
    %90 = vector.load %arg7[%c0_29, %c0_30] : memref<40x17xf32, #tpu.memory_space<vmem>>, vector<32x17xf32>
    %cst_31 = arith.constant dense<0.000000e+00> : vector<8x17xf32>
    %91 = tpu.matmul %89, %90, %cst_31 {dimension_numbers = #tpu.dot_dimension_numbers<[1], [0], [0], [1], [0, 0, 1, 1], [], []>} : vector<8x32xf32>, vector<32x17xf32>, vector<8x17xf32> -> vector<8x17xf32>
    %c32_32 = arith.constant 32 : index
    %c0_33 = arith.constant 0 : index
    %92 = vector.load %arg7[%c32_32, %c0_33] : memref<40x17xf32, #tpu.memory_space<vmem>>, vector<1x17xf32>
    %93 = vector.broadcast %92 : vector<1x17xf32> to vector<8x17xf32>
    %94 = arith.addf %91, %93 : vector<8x17xf32>
    %95 = vector.extract_strided_slice %94 {offsets = [0, 0], sizes = [8, 16], strides = [1, 1]} : vector<8x17xf32> to vector<8x16xf32>
    %96 = vector.extract_strided_slice %94 {offsets = [0, 16], sizes = [8, 1], strides = [1, 1]} : vector<8x17xf32> to vector<8x1xf32>
    %c0_i32_34 = arith.constant 0 : i32
    %97 = arith.cmpi eq, %arg2, %c0_i32_34 : i32
    %98 = arith.extui %97 : i1 to i32
    %c0_i32_35 = arith.constant 0 : i32
    %99 = arith.cmpi ne, %98, %c0_i32_35 : i32
    scf.if %99 {
      %cst_53 = arith.constant 0xFF800000 : f32
      %129 = vector.broadcast %cst_53 : f32 to vector<8x1xf32>
      %c0_54 = arith.constant 0 : index
      %c0_55 = arith.constant 0 : index
      %130 = vector.load %arg11[%c0_54, %c0_55] : memref<8x1xf32, #tpu.memory_space<vmem>>, vector<8x1xf32>
      tpu.vector_store %arg11[%c0_54, %c0_55], %129 {strides = array<i32>} : memref<8x1xf32, #tpu.memory_space<vmem>>, vector<8x1xf32>,
      %cst_56 = arith.constant 0.000000e+00 : f32
      %131 = vector.broadcast %cst_56 : f32 to vector<8x1xf32>
      %c0_57 = arith.constant 0 : index
      %c0_58 = arith.constant 0 : index
      %132 = vector.load %arg12[%c0_57, %c0_58] : memref<8x1xf32, #tpu.memory_space<vmem>>, vector<8x1xf32>
      tpu.vector_store %arg12[%c0_57, %c0_58], %131 {strides = array<i32>} : memref<8x1xf32, #tpu.memory_space<vmem>>, vector<8x1xf32>,
      %cst_59 = arith.constant 0.000000e+00 : f32
      %133 = vector.broadcast %cst_59 : f32 to vector<8x16xf32>
      %c0_60 = arith.constant 0 : index
      %c0_61 = arith.constant 0 : index
      %134 = vector.load %arg13[%c0_60, %c0_61] : memref<8x16xf32, #tpu.memory_space<vmem>>, vector<8x16xf32>
      tpu.vector_store %arg13[%c0_60, %c0_61], %133 {strides = array<i32>} : memref<8x16xf32, #tpu.memory_space<vmem>>, vector<8x16xf32>,
      %cst_62 = arith.constant 0.000000e+00 : f32
      %135 = vector.broadcast %cst_62 : f32 to vector<8x16xf32>
      %c0_63 = arith.constant 0 : index
      %c0_64 = arith.constant 0 : index
      %136 = vector.load %arg14[%c0_63, %c0_64] : memref<8x16xf32, #tpu.memory_space<vmem>>, vector<8x16xf32>
      tpu.vector_store %arg14[%c0_63, %c0_64], %135 {strides = array<i32>} : memref<8x16xf32, #tpu.memory_space<vmem>>, vector<8x16xf32>,
    } else {
    }
    %c0_36 = arith.constant 0 : index
    %c0_37 = arith.constant 0 : index
    %100 = vector.load %arg11[%c0_36, %c0_37] : memref<8x1xf32, #tpu.memory_space<vmem>>, vector<8x1xf32>
    %101 = arith.maximumf %100, %96 : vector<8x1xf32>
    %102 = arith.subf %100, %101 : vector<8x1xf32>
    %103 = math.exp %102 : vector<8x1xf32>
    %104 = arith.subf %96, %101 : vector<8x1xf32>
    %105 = math.exp %104 : vector<8x1xf32>
    %c0_38 = arith.constant 0 : index
    %c0_39 = arith.constant 0 : index
    %106 = vector.load %arg12[%c0_38, %c0_39] : memref<8x1xf32, #tpu.memory_space<vmem>>, vector<8x1xf32>
    %107 = arith.mulf %103, %106 : vector<8x1xf32>
    %108 = arith.addf %107, %105 : vector<8x1xf32>
    %c0_40 = arith.constant 0 : index
    %c0_41 = arith.constant 0 : index
    %109 = vector.load %arg12[%c0_40, %c0_41] : memref<8x1xf32, #tpu.memory_space<vmem>>, vector<8x1xf32>
    tpu.vector_store %arg12[%c0_40, %c0_41], %108 {strides = array<i32>} : memref<8x1xf32, #tpu.memory_space<vmem>>, vector<8x1xf32>,
    %c0_42 = arith.constant 0 : index
    %c0_43 = arith.constant 0 : index
    %110 = vector.load %arg13[%c0_42, %c0_43] : memref<8x16xf32, #tpu.memory_space<vmem>>, vector<8x16xf32>
    %111 = vector.broadcast %103 : vector<8x1xf32> to vector<8x16xf32>
    %112 = arith.mulf %111, %110 : vector<8x16xf32>
    %113 = vector.broadcast %105 : vector<8x1xf32> to vector<8x16xf32>
    %114 = arith.mulf %113, %95 : vector<8x16xf32>
    %115 = arith.addf %112, %114 : vector<8x16xf32>
    %c0_44 = arith.constant 0 : index
    %c0_45 = arith.constant 0 : index
    %116 = vector.load %arg13[%c0_44, %c0_45] : memref<8x16xf32, #tpu.memory_space<vmem>>, vector<8x16xf32>
    tpu.vector_store %arg13[%c0_44, %c0_45], %115 {strides = array<i32>} : memref<8x16xf32, #tpu.memory_space<vmem>>, vector<8x16xf32>,
    %c0_46 = arith.constant 0 : index
    %c0_47 = arith.constant 0 : index
    %117 = vector.load %arg14[%c0_46, %c0_47] : memref<8x16xf32, #tpu.memory_space<vmem>>, vector<8x16xf32>
    %118 = vector.broadcast %103 : vector<8x1xf32> to vector<8x16xf32>
    %119 = arith.mulf %118, %117 : vector<8x16xf32>
    %120 = arith.mulf %95, %95 : vector<8x16xf32>
    %121 = vector.broadcast %105 : vector<8x1xf32> to vector<8x16xf32>
    %122 = arith.mulf %121, %120 : vector<8x16xf32>
    %123 = arith.addf %119, %122 : vector<8x16xf32>
    %c0_48 = arith.constant 0 : index
    %c0_49 = arith.constant 0 : index
    %124 = vector.load %arg14[%c0_48, %c0_49] : memref<8x16xf32, #tpu.memory_space<vmem>>, vector<8x16xf32>
    tpu.vector_store %arg14[%c0_48, %c0_49], %123 {strides = array<i32>} : memref<8x16xf32, #tpu.memory_space<vmem>>, vector<8x16xf32>,
    %c0_50 = arith.constant 0 : index
    %c0_51 = arith.constant 0 : index
    %125 = vector.load %arg11[%c0_50, %c0_51] : memref<8x1xf32, #tpu.memory_space<vmem>>, vector<8x1xf32>
    tpu.vector_store %arg11[%c0_50, %c0_51], %101 {strides = array<i32>} : memref<8x1xf32, #tpu.memory_space<vmem>>, vector<8x1xf32>,
    %c2_i32 = arith.constant 2 : i32
    %126 = arith.cmpi eq, %arg2, %c2_i32 : i32
    %127 = arith.extui %126 : i1 to i32
    %c0_i32_52 = arith.constant 0 : i32
    %128 = arith.cmpi ne, %127, %c0_i32_52 : i32
    scf.if %128 {
      %c0_53 = arith.constant 0 : index
      %c0_54 = arith.constant 0 : index
      %129 = vector.load %arg12[%c0_53, %c0_54] : memref<8x1xf32, #tpu.memory_space<vmem>>, vector<8x1xf32>
      %130 = tpu.reciprocal %129 : vector<8x1xf32> -> vector<8x1xf32>
      %c0_55 = arith.constant 0 : index
      %c0_56 = arith.constant 0 : index
      %131 = vector.load %arg13[%c0_55, %c0_56] : memref<8x16xf32, #tpu.memory_space<vmem>>, vector<8x16xf32>
      %132 = vector.broadcast %130 : vector<8x1xf32> to vector<8x16xf32>
      %133 = arith.mulf %131, %132 : vector<8x16xf32>
      %c0_57 = arith.constant 0 : index
      %c0_58 = arith.constant 0 : index
      %134 = vector.load %arg14[%c0_57, %c0_58] : memref<8x16xf32, #tpu.memory_space<vmem>>, vector<8x16xf32>
      %135 = vector.broadcast %130 : vector<8x1xf32> to vector<8x16xf32>
      %136 = arith.mulf %134, %135 : vector<8x16xf32>
      %137 = arith.mulf %133, %133 : vector<8x16xf32>
      %138 = arith.subf %136, %137 : vector<8x16xf32>
      %cst_59 = arith.constant 0.000000e+00 : f32
      %139 = vector.broadcast %cst_59 : f32 to vector<8x16xf32>
      %140 = arith.maximumf %138, %139 : vector<8x16xf32>
      %c0_60 = arith.constant 0 : index
      %c0_61 = arith.constant 0 : index
      %141 = vector.load %arg8[%c0_60, %c0_61] : memref<40x32xf32, #tpu.memory_space<vmem>>, vector<16x32xf32>
      %cst_62 = arith.constant dense<0.000000e+00> : vector<8x32xf32>
      %142 = tpu.matmul %133, %141, %cst_62 {dimension_numbers = #tpu.dot_dimension_numbers<[1], [0], [0], [1], [0, 0, 1, 1], [], []>} : vector<8x16xf32>, vector<16x32xf32>, vector<8x32xf32> -> vector<8x32xf32>
      %c16 = arith.constant 16 : index
      %c0_63 = arith.constant 0 : index
      %143 = vector.load %arg8[%c16, %c0_63] : memref<40x32xf32, #tpu.memory_space<vmem>>, vector<16x32xf32>
      %cst_64 = arith.constant dense<0.000000e+00> : vector<8x32xf32>
      %144 = tpu.matmul %140, %143, %cst_64 {dimension_numbers = #tpu.dot_dimension_numbers<[1], [0], [0], [1], [0, 0, 1, 1], [], []>} : vector<8x16xf32>, vector<16x32xf32>, vector<8x32xf32> -> vector<8x32xf32>
      %145 = arith.addf %142, %144 : vector<8x32xf32>
      %c32_65 = arith.constant 32 : index
      %c0_66 = arith.constant 0 : index
      %146 = vector.load %arg8[%c32_65, %c0_66] : memref<40x32xf32, #tpu.memory_space<vmem>>, vector<1x32xf32>
      %147 = vector.broadcast %146 : vector<1x32xf32> to vector<8x32xf32>
      %148 = arith.addf %145, %147 : vector<8x32xf32>
      %cst_67 = arith.constant 0.000000e+00 : f32
      %149 = vector.broadcast %cst_67 : f32 to vector<8x32xf32>
      %150 = arith.maximumf %148, %149 : vector<8x32xf32>
      %c0_68 = arith.constant 0 : index
      %c0_69 = arith.constant 0 : index
      %151 = vector.load %arg9[%c0_68, %c0_69] : memref<40x4xf32, #tpu.memory_space<vmem>>, vector<32x4xf32>
      %cst_70 = arith.constant dense<0.000000e+00> : vector<8x4xf32>
      %152 = tpu.matmul %150, %151, %cst_70 {dimension_numbers = #tpu.dot_dimension_numbers<[1], [0], [0], [1], [0, 0, 1, 1], [], []>} : vector<8x32xf32>, vector<32x4xf32>, vector<8x4xf32> -> vector<8x4xf32>
      %c32_71 = arith.constant 32 : index
      %c0_72 = arith.constant 0 : index
      %153 = vector.load %arg9[%c32_71, %c0_72] : memref<40x4xf32, #tpu.memory_space<vmem>>, vector<1x4xf32>
      %154 = vector.broadcast %153 : vector<1x4xf32> to vector<8x4xf32>
      %155 = arith.addf %152, %154 : vector<8x4xf32>
      %c0_73 = arith.constant 0 : index
      %c0_74 = arith.constant 0 : index
      %c0_75 = arith.constant 0 : index
      %156 = vector.load %arg10[%c0_73, %c0_74, %c0_75] : memref<1x8x4xf32, #tpu.memory_space<vmem>>, vector<1x8x4xf32>
      %157 = vector.shape_cast %156 : vector<1x8x4xf32> to vector<8x4xf32>
      %158 = vector.shape_cast %155 : vector<8x4xf32> to vector<1x8x4xf32>
      tpu.vector_store %arg10[%c0_73, %c0_74, %c0_75], %158 {strides = array<i32>} : memref<1x8x4xf32, #tpu.memory_space<vmem>>, vector<1x8x4xf32>,
    } else {
    }
    return
  }
  func.func @transform_0(%arg0: i32, %arg1: i32, %arg2: i32) -> (i32, i32, i32) {
    %c0_i32 = arith.constant 0 : i32
    %c0_i32_0 = arith.constant 0 : i32
    return %arg0, %arg1, %c0_i32 : i32, i32, i32
  }
  func.func @transform_1(%arg0: i32, %arg1: i32, %arg2: i32) -> (i32, i32, i32) {
    %c3_i32 = arith.constant 3 : i32
    %0 = arith.muli %arg0, %c3_i32 : i32
    %1 = arith.addi %0, %arg2 : i32
    %c0_i32 = arith.constant 0 : i32
    %c0_i32_0 = arith.constant 0 : i32
    %c0_i32_1 = arith.constant 0 : i32
    return %1, %c0_i32, %c0_i32_0 : i32, i32, i32
  }
  func.func @transform_2(%arg0: i32, %arg1: i32, %arg2: i32) -> (i32, i32, i32) {
    %c3_i32 = arith.constant 3 : i32
    %0 = arith.muli %arg0, %c3_i32 : i32
    %1 = arith.addi %0, %arg2 : i32
    %c0_i32 = arith.constant 0 : i32
    %c0_i32_0 = arith.constant 0 : i32
    %c0_i32_1 = arith.constant 0 : i32
    return %1, %c0_i32, %c0_i32_0 : i32, i32, i32
  }
  func.func @transform_3(%arg0: i32, %arg1: i32, %arg2: i32) -> (i32, i32) {
    %c0_i32 = arith.constant 0 : i32
    %c0_i32_0 = arith.constant 0 : i32
    %c0_i32_1 = arith.constant 0 : i32
    return %c0_i32, %c0_i32_0 : i32, i32
  }
  func.func @transform_4(%arg0: i32, %arg1: i32, %arg2: i32) -> (i32, i32) {
    %c0_i32 = arith.constant 0 : i32
    %c0_i32_0 = arith.constant 0 : i32
    %c0_i32_1 = arith.constant 0 : i32
    return %c0_i32, %c0_i32_0 : i32, i32
  }
  func.func @transform_5(%arg0: i32, %arg1: i32, %arg2: i32) -> (i32, i32) {
    %c0_i32 = arith.constant 0 : i32
    %c0_i32_0 = arith.constant 0 : i32
    %c0_i32_1 = arith.constant 0 : i32
    return %c0_i32, %c0_i32_0 : i32, i32
  }
  func.func @transform_6(%arg0: i32, %arg1: i32, %arg2: i32) -> (i32, i32) {
    %c0_i32 = arith.constant 0 : i32
    %c0_i32_0 = arith.constant 0 : i32
    %c0_i32_1 = arith.constant 0 : i32
    return %c0_i32, %c0_i32_0 : i32, i32
  }
  func.func @transform_7(%arg0: i32, %arg1: i32, %arg2: i32) -> (i32, i32, i32) {
    %c0_i32 = arith.constant 0 : i32
    %c0_i32_0 = arith.constant 0 : i32
    return %arg0, %arg1, %c0_i32 : i32, i32, i32
  }
}

module attributes {stable_mosaic.version = 11 : i64} {
  func.func @kernel(%arg0: i32, %arg1: i32, %arg2: i32, %arg3: memref<1x8x8xf32, #tpu.memory_space<vmem>>, %arg4: memref<1x8x16xf32, #tpu.memory_space<vmem>>, %arg5: memref<1x64x32xf32, #tpu.memory_space<vmem>>, %arg6: memref<48x32xf32, #tpu.memory_space<vmem>>, %arg7: memref<40x17xf32, #tpu.memory_space<vmem>>, %arg8: memref<40x32xf32, #tpu.memory_space<vmem>>, %arg9: memref<40x4xf32, #tpu.memory_space<vmem>>, %arg10: memref<1x8x4xf32, #tpu.memory_space<vmem>>, %arg11: memref<8x1xf32, #tpu.memory_space<vmem>>, %arg12: memref<8x1xf32, #tpu.memory_space<vmem>>, %arg13: memref<8x16xf32, #tpu.memory_space<vmem>>, %arg14: memref<8x16xf32, #tpu.memory_space<vmem>>) attributes {dimension_semantics = [#tpu.dimension_semantics<parallel>, #tpu.dimension_semantics<parallel>, #tpu.dimension_semantics<arbitrary>], iteration_bounds = array<i64: 2, 1, 3>, scalar_prefetch = 0 : i64, scratch_operands = 4 : i64, tpu.core_type = #tpu.core_type<tc>, window_params = [{transform_indices = @transform_0, window_bounds = array<i64: 1, 8, 8>}, {transform_indices = @transform_1, window_bounds = array<i64: 1, 8, 16>}, {transform_indices = @transform_2, window_bounds = array<i64: 1, 64, 32>}, {pipeline_mode = #tpu.pipeline_mode<synchronous>, transform_indices = @transform_3, window_bounds = array<i64: 48, 32>}, {pipeline_mode = #tpu.pipeline_mode<synchronous>, transform_indices = @transform_4, window_bounds = array<i64: 40, 17>}, {pipeline_mode = #tpu.pipeline_mode<synchronous>, transform_indices = @transform_5, window_bounds = array<i64: 40, 32>}, {pipeline_mode = #tpu.pipeline_mode<synchronous>, transform_indices = @transform_6, window_bounds = array<i64: 40, 4>}, {transform_indices = @transform_7, window_bounds = array<i64: 1, 8, 4>}]} {
    %c0 = arith.constant 0 : index
    %c0_0 = arith.constant 0 : index
    %c0_1 = arith.constant 0 : index
    %0 = vector.load %arg3[%c0, %c0_0, %c0_1] : memref<1x8x8xf32, #tpu.memory_space<vmem>>, vector<1x8x8xf32>
    %1 = vector.shape_cast %0 : vector<1x8x8xf32> to vector<8x8xf32>
    %c0_2 = arith.constant 0 : index
    %c0_3 = arith.constant 0 : index
    %c0_4 = arith.constant 0 : index
    %2 = vector.load %arg4[%c0_2, %c0_3, %c0_4] : memref<1x8x16xf32, #tpu.memory_space<vmem>>, vector<1x8x16xf32>
    %3 = vector.shape_cast %2 : vector<1x8x16xf32> to vector<8x16xf32>
    %cst = arith.constant dense<0.000000e+00> : vector<8x16xf32>
    %4 = tpu.matmul %1, %3, %cst {dimension_numbers = #tpu.dot_dimension_numbers<[1], [0], [0], [1], [0, 0, 1, 1], [], []>} : vector<8x8xf32>, vector<8x16xf32>, vector<8x16xf32> -> vector<8x16xf32>
    %5 = vector.extract_strided_slice %4 {offsets = [0, 2], sizes = [8, 1], strides = [1, 1]} : vector<8x16xf32> to vector<8x1xf32>
    %6 = vector.extract_strided_slice %4 {offsets = [0, 3], sizes = [8, 1], strides = [1, 1]} : vector<8x16xf32> to vector<8x1xf32>
    %7 = arith.divf %6, %5 : vector<8x1xf32>
    %cst_5 = arith.constant 0.000000e+00 : f32
    %cst_6 = arith.constant 7.000000e+00 : f32
    %8 = vector.broadcast %cst_5 : f32 to vector<8x1xf32>
    %9 = arith.maximumf %8, %7 : vector<8x1xf32>
    %10 = vector.broadcast %cst_6 : f32 to vector<8x1xf32>
    %11 = arith.minimumf %10, %9 : vector<8x1xf32>
    %12 = vector.extract_strided_slice %4 {offsets = [0, 4], sizes = [8, 1], strides = [1, 1]} : vector<8x16xf32> to vector<8x1xf32>
    %13 = arith.divf %12, %5 : vector<8x1xf32>
    %cst_7 = arith.constant 0.000000e+00 : f32
    %cst_8 = arith.constant 7.000000e+00 : f32
    %14 = vector.broadcast %cst_7 : f32 to vector<8x1xf32>
    %15 = arith.maximumf %14, %13 : vector<8x1xf32>
    %16 = vector.broadcast %cst_8 : f32 to vector<8x1xf32>
    %17 = arith.minimumf %16, %15 : vector<8x1xf32>
    %18 = math.floor %11 : vector<8x1xf32>
    %19 = math.floor %17 : vector<8x1xf32>
    %20 = arith.subf %11, %18 : vector<8x1xf32>
    %cst_9 = arith.constant 1.000000e+00 : f32
    %21 = vector.broadcast %cst_9 : f32 to vector<8x1xf32>
    %22 = arith.subf %21, %20 : vector<8x1xf32>
    %23 = arith.subf %17, %19 : vector<8x1xf32>
    %cst_10 = arith.constant 1.000000e+00 : f32
    %24 = vector.broadcast %cst_10 : f32 to vector<8x1xf32>
    %25 = arith.subf %24, %23 : vector<8x1xf32>
    %26 = arith.fptosi %18 : vector<8x1xf32> to vector<8x1xi32>
    %27 = arith.fptosi %19 : vector<8x1xf32> to vector<8x1xi32>
    %c1_i32 = arith.constant 1 : i32
    %28 = vector.broadcast %c1_i32 : i32 to vector<8x1xi32>
    %29 = arith.addi %26, %28 : vector<8x1xi32>
    %c7_i32 = arith.constant 7 : i32
    %30 = vector.broadcast %c7_i32 : i32 to vector<8x1xi32>
    %31 = arith.minsi %29, %30 : vector<8x1xi32>
    %c1_i32_11 = arith.constant 1 : i32
    %32 = vector.broadcast %c1_i32_11 : i32 to vector<8x1xi32>
    %33 = arith.addi %27, %32 : vector<8x1xi32>
    %c7_i32_12 = arith.constant 7 : i32
    %34 = vector.broadcast %c7_i32_12 : i32 to vector<8x1xi32>
    %35 = arith.minsi %33, %34 : vector<8x1xi32>
    %c8_i32 = arith.constant 8 : i32
    %36 = vector.broadcast %c8_i32 : i32 to vector<8x1xi32>
    %37 = arith.muli %27, %36 : vector<8x1xi32>
    %c8_i32_13 = arith.constant 8 : i32
    %38 = vector.broadcast %c8_i32_13 : i32 to vector<8x1xi32>
    %39 = arith.muli %35, %38 : vector<8x1xi32>
    %40 = arith.addi %37, %26 : vector<8x1xi32>
    %41 = arith.addi %37, %31 : vector<8x1xi32>
    %42 = arith.addi %39, %26 : vector<8x1xi32>
    %43 = arith.addi %39, %31 : vector<8x1xi32>
    %44 = arith.mulf %25, %22 : vector<8x1xf32>
    %45 = arith.mulf %25, %20 : vector<8x1xf32>
    %46 = arith.mulf %23, %22 : vector<8x1xf32>
    %47 = arith.mulf %23, %20 : vector<8x1xf32>
    %48 = tpu.iota {dimensions = array<i32: 1>} : vector<8x64xi32>
    %cst_14 = arith.constant 0.000000e+00 : f32
    %49 = vector.broadcast %cst_14 : f32 to vector<8x32xf32>
    %c0_i32 = arith.constant 0 : i32
    %50 = vector.broadcast %c0_i32 : i32 to vector<8x1xi32>
    %51 = arith.subi %43, %50 : vector<8x1xi32>
    %52 = vector.broadcast %51 : vector<8x1xi32> to vector<8x64xi32>
    %53 = arith.cmpi eq, %48, %52 : vector<8x64xi32>
    %cst_15 = arith.constant 0.000000e+00 : f32
    %54 = vector.shape_cast %47 : vector<8x1xf32> to vector<8x1xf32>
    %55 = vector.broadcast %54 : vector<8x1xf32> to vector<8x64xf32>
    %56 = vector.broadcast %cst_15 : f32 to vector<8x64xf32>
    %57 = arith.select %53, %55, %56 : vector<8x64xi1>, vector<8x64xf32>
    %c0_i32_16 = arith.constant 0 : i32
    %58 = vector.broadcast %c0_i32_16 : i32 to vector<8x1xi32>
    %59 = arith.subi %42, %58 : vector<8x1xi32>
    %60 = vector.broadcast %59 : vector<8x1xi32> to vector<8x64xi32>
    %61 = arith.cmpi eq, %48, %60 : vector<8x64xi32>
    %62 = vector.shape_cast %46 : vector<8x1xf32> to vector<8x1xf32>
    %63 = vector.broadcast %62 : vector<8x1xf32> to vector<8x64xf32>
    %64 = arith.select %61, %63, %57 : vector<8x64xi1>, vector<8x64xf32>
    %c0_i32_17 = arith.constant 0 : i32
    %65 = vector.broadcast %c0_i32_17 : i32 to vector<8x1xi32>
    %66 = arith.subi %41, %65 : vector<8x1xi32>
    %67 = vector.broadcast %66 : vector<8x1xi32> to vector<8x64xi32>
    %68 = arith.cmpi eq, %48, %67 : vector<8x64xi32>
    %69 = vector.shape_cast %45 : vector<8x1xf32> to vector<8x1xf32>
    %70 = vector.broadcast %69 : vector<8x1xf32> to vector<8x64xf32>
    %71 = arith.select %68, %70, %64 : vector<8x64xi1>, vector<8x64xf32>
    %c0_i32_18 = arith.constant 0 : i32
    %72 = vector.broadcast %c0_i32_18 : i32 to vector<8x1xi32>
    %73 = arith.subi %40, %72 : vector<8x1xi32>
    %74 = vector.broadcast %73 : vector<8x1xi32> to vector<8x64xi32>
    %75 = arith.cmpi eq, %48, %74 : vector<8x64xi32>
    %76 = vector.shape_cast %44 : vector<8x1xf32> to vector<8x1xf32>
    %77 = vector.broadcast %76 : vector<8x1xf32> to vector<8x64xf32>
    %78 = arith.select %75, %77, %71 : vector<8x64xi1>, vector<8x64xf32>
    %c0_19 = arith.constant 0 : index
    %c0_20 = arith.constant 0 : index
    %c0_21 = arith.constant 0 : index
    %79 = vector.load %arg5[%c0_19, %c0_20, %c0_21] : memref<1x64x32xf32, #tpu.memory_space<vmem>>, vector<1x64x32xf32>
    %80 = vector.shape_cast %79 : vector<1x64x32xf32> to vector<64x32xf32>
    %cst_22 = arith.constant dense<0.000000e+00> : vector<8x32xf32>
    %81 = tpu.matmul %78, %80, %cst_22 {dimension_numbers = #tpu.dot_dimension_numbers<[1], [0], [0], [1], [0, 0, 1, 1], [], []>} : vector<8x64xf32>, vector<64x32xf32>, vector<8x32xf32> -> vector<8x32xf32>
    %82 = arith.addf %49, %81 : vector<8x32xf32>
    %c0_23 = arith.constant 0 : index
    %c0_24 = arith.constant 0 : index
    %83 = vector.load %arg6[%c0_23, %c0_24] : memref<48x32xf32, #tpu.memory_space<vmem>>, vector<32x32xf32>
    %cst_25 = arith.constant dense<0.000000e+00> : vector<8x32xf32>
    %84 = tpu.matmul %82, %83, %cst_25 {dimension_numbers = #tpu.dot_dimension_numbers<[1], [0], [0], [1], [0, 0, 1, 1], [], []>} : vector<8x32xf32>, vector<32x32xf32>, vector<8x32xf32> -> vector<8x32xf32>
    %c32 = arith.constant 32 : index
    %c0_26 = arith.constant 0 : index
    %85 = vector.load %arg6[%c32, %c0_26] : memref<48x32xf32, #tpu.memory_space<vmem>>, vector<16x32xf32>
    %cst_27 = arith.constant dense<0.000000e+00> : vector<8x32xf32>
    %86 = tpu.matmul %4, %85, %cst_27 {dimension_numbers = #tpu.dot_dimension_numbers<[1], [0], [0], [1], [0, 0, 1, 1], [], []>} : vector<8x16xf32>, vector<16x32xf32>, vector<8x32xf32> -> vector<8x32xf32>
    %87 = arith.addf %84, %86 : vector<8x32xf32>
    %cst_28 = arith.constant 0.000000e+00 : f32
    %88 = vector.broadcast %cst_28 : f32 to vector<8x32xf32>
    %89 = arith.maximumf %87, %88 : vector<8x32xf32>
    %c0_29 = arith.constant 0 : index
    %c0_30 = arith.constant 0 : index
    %90 = vector.load %arg7[%c0_29, %c0_30] : memref<40x17xf32, #tpu.memory_space<vmem>>, vector<32x17xf32>
    %cst_31 = arith.constant dense<0.000000e+00> : vector<8x17xf32>
    %91 = tpu.matmul %89, %90, %cst_31 {dimension_numbers = #tpu.dot_dimension_numbers<[1], [0], [0], [1], [0, 0, 1, 1], [], []>} : vector<8x32xf32>, vector<32x17xf32>, vector<8x17xf32> -> vector<8x17xf32>
    %c32_32 = arith.constant 32 : index
    %c0_33 = arith.constant 0 : index
    %92 = vector.load %arg7[%c32_32, %c0_33] : memref<40x17xf32, #tpu.memory_space<vmem>>, vector<1x17xf32>
    %93 = vector.broadcast %92 : vector<1x17xf32> to vector<8x17xf32>
    %94 = arith.addf %91, %93 : vector<8x17xf32>
    %95 = vector.extract_strided_slice %94 {offsets = [0, 0], sizes = [8, 16], strides = [1, 1]} : vector<8x17xf32> to vector<8x16xf32>
    %96 = vector.extract_strided_slice %94 {offsets = [0, 16], sizes = [8, 1], strides = [1, 1]} : vector<8x17xf32> to vector<8x1xf32>
    %c0_i32_34 = arith.constant 0 : i32
    %97 = arith.cmpi eq, %arg2, %c0_i32_34 : i32
    %98 = arith.extui %97 : i1 to i32
    %c0_i32_35 = arith.constant 0 : i32
    %99 = arith.cmpi ne, %98, %c0_i32_35 : i32
    scf.if %99 {
      %cst_53 = arith.constant 0xFF800000 : f32
      %129 = vector.broadcast %cst_53 : f32 to vector<8x1xf32>
      %c0_54 = arith.constant 0 : index
      %c0_55 = arith.constant 0 : index
      %130 = vector.load %arg11[%c0_54, %c0_55] : memref<8x1xf32, #tpu.memory_space<vmem>>, vector<8x1xf32>
      tpu.vector_store %arg11[%c0_54, %c0_55], %129 {strides = array<i32>} : memref<8x1xf32, #tpu.memory_space<vmem>>, vector<8x1xf32>,
      %cst_56 = arith.constant 0.000000e+00 : f32
      %131 = vector.broadcast %cst_56 : f32 to vector<8x1xf32>
      %c0_57 = arith.constant 0 : index
      %c0_58 = arith.constant 0 : index
      %132 = vector.load %arg12[%c0_57, %c0_58] : memref<8x1xf32, #tpu.memory_space<vmem>>, vector<8x1xf32>
      tpu.vector_store %arg12[%c0_57, %c0_58], %131 {strides = array<i32>} : memref<8x1xf32, #tpu.memory_space<vmem>>, vector<8x1xf32>,
      %cst_59 = arith.constant 0.000000e+00 : f32
      %133 = vector.broadcast %cst_59 : f32 to vector<8x16xf32>
      %c0_60 = arith.constant 0 : index
      %c0_61 = arith.constant 0 : index
      %134 = vector.load %arg13[%c0_60, %c0_61] : memref<8x16xf32, #tpu.memory_space<vmem>>, vector<8x16xf32>
      tpu.vector_store %arg13[%c0_60, %c0_61], %133 {strides = array<i32>} : memref<8x16xf32, #tpu.memory_space<vmem>>, vector<8x16xf32>,
      %cst_62 = arith.constant 0.000000e+00 : f32
      %135 = vector.broadcast %cst_62 : f32 to vector<8x16xf32>
      %c0_63 = arith.constant 0 : index
      %c0_64 = arith.constant 0 : index
      %136 = vector.load %arg14[%c0_63, %c0_64] : memref<8x16xf32, #tpu.memory_space<vmem>>, vector<8x16xf32>
      tpu.vector_store %arg14[%c0_63, %c0_64], %135 {strides = array<i32>} : memref<8x16xf32, #tpu.memory_space<vmem>>, vector<8x16xf32>,
    } else {
    }
    %c0_36 = arith.constant 0 : index
    %c0_37 = arith.constant 0 : index
    %100 = vector.load %arg11[%c0_36, %c0_37] : memref<8x1xf32, #tpu.memory_space<vmem>>, vector<8x1xf32>
    %101 = arith.maximumf %100, %96 : vector<8x1xf32>
    %102 = arith.subf %100, %101 : vector<8x1xf32>
    %103 = math.exp %102 : vector<8x1xf32>
    %104 = arith.subf %96, %101 : vector<8x1xf32>
    %105 = math.exp %104 : vector<8x1xf32>
    %c0_38 = arith.constant 0 : index
    %c0_39 = arith.constant 0 : index
    %106 = vector.load %arg12[%c0_38, %c0_39] : memref<8x1xf32, #tpu.memory_space<vmem>>, vector<8x1xf32>
    %107 = arith.mulf %103, %106 : vector<8x1xf32>
    %108 = arith.addf %107, %105 : vector<8x1xf32>
    %c0_40 = arith.constant 0 : index
    %c0_41 = arith.constant 0 : index
    %109 = vector.load %arg12[%c0_40, %c0_41] : memref<8x1xf32, #tpu.memory_space<vmem>>, vector<8x1xf32>
    tpu.vector_store %arg12[%c0_40, %c0_41], %108 {strides = array<i32>} : memref<8x1xf32, #tpu.memory_space<vmem>>, vector<8x1xf32>,
    %c0_42 = arith.constant 0 : index
    %c0_43 = arith.constant 0 : index
    %110 = vector.load %arg13[%c0_42, %c0_43] : memref<8x16xf32, #tpu.memory_space<vmem>>, vector<8x16xf32>
    %111 = vector.broadcast %103 : vector<8x1xf32> to vector<8x16xf32>
    %112 = arith.mulf %111, %110 : vector<8x16xf32>
    %113 = vector.broadcast %105 : vector<8x1xf32> to vector<8x16xf32>
    %114 = arith.mulf %113, %95 : vector<8x16xf32>
    %115 = arith.addf %112, %114 : vector<8x16xf32>
    %c0_44 = arith.constant 0 : index
    %c0_45 = arith.constant 0 : index
    %116 = vector.load %arg13[%c0_44, %c0_45] : memref<8x16xf32, #tpu.memory_space<vmem>>, vector<8x16xf32>
    tpu.vector_store %arg13[%c0_44, %c0_45], %115 {strides = array<i32>} : memref<8x16xf32, #tpu.memory_space<vmem>>, vector<8x16xf32>,
    %c0_46 = arith.constant 0 : index
    %c0_47 = arith.constant 0 : index
    %117 = vector.load %arg14[%c0_46, %c0_47] : memref<8x16xf32, #tpu.memory_space<vmem>>, vector<8x16xf32>
    %118 = vector.broadcast %103 : vector<8x1xf32> to vector<8x16xf32>
    %119 = arith.mulf %118, %117 : vector<8x16xf32>
    %120 = arith.mulf %95, %95 : vector<8x16xf32>
    %121 = vector.broadcast %105 : vector<8x1xf32> to vector<8x16xf32>
    %122 = arith.mulf %121, %120 : vector<8x16xf32>
    %123 = arith.addf %119, %122 : vector<8x16xf32>
    %c0_48 = arith.constant 0 : index
    %c0_49 = arith.constant 0 : index
    %124 = vector.load %arg14[%c0_48, %c0_49] : memref<8x16xf32, #tpu.memory_space<vmem>>, vector<8x16xf32>
    tpu.vector_store %arg14[%c0_48, %c0_49], %123 {strides = array<i32>} : memref<8x16xf32, #tpu.memory_space<vmem>>, vector<8x16xf32>,
    %c0_50 = arith.constant 0 : index
    %c0_51 = arith.constant 0 : index
    %125 = vector.load %arg11[%c0_50, %c0_51] : memref<8x1xf32, #tpu.memory_space<vmem>>, vector<8x1xf32>
    tpu.vector_store %arg11[%c0_50, %c0_51], %101 {strides = array<i32>} : memref<8x1xf32, #tpu.memory_space<vmem>>, vector<8x1xf32>,
    %c2_i32 = arith.constant 2 : i32
    %126 = arith.cmpi eq, %arg2, %c2_i32 : i32
    %127 = arith.extui %126 : i1 to i32
    %c0_i32_52 = arith.constant 0 : i32
    %128 = arith.cmpi ne, %127, %c0_i32_52 : i32
    scf.if %128 {
      %c0_53 = arith.constant 0 : index
      %c0_54 = arith.constant 0 : index
      %129 = vector.load %arg12[%c0_53, %c0_54] : memref<8x1xf32, #tpu.memory_space<vmem>>, vector<8x1xf32>
      %130 = tpu.reciprocal %129 : vector<8x1xf32> -> vector<8x1xf32>
      %c0_55 = arith.constant 0 : index
      %c0_56 = arith.constant 0 : index
      %131 = vector.load %arg13[%c0_55, %c0_56] : memref<8x16xf32, #tpu.memory_space<vmem>>, vector<8x16xf32>
      %132 = vector.broadcast %130 : vector<8x1xf32> to vector<8x16xf32>
      %133 = arith.mulf %131, %132 : vector<8x16xf32>
      %c0_57 = arith.constant 0 : index
      %c0_58 = arith.constant 0 : index
      %134 = vector.load %arg14[%c0_57, %c0_58] : memref<8x16xf32, #tpu.memory_space<vmem>>, vector<8x16xf32>
      %135 = vector.broadcast %130 : vector<8x1xf32> to vector<8x16xf32>
      %136 = arith.mulf %134, %135 : vector<8x16xf32>
      %137 = arith.mulf %133, %133 : vector<8x16xf32>
      %138 = arith.subf %136, %137 : vector<8x16xf32>
      %cst_59 = arith.constant 0.000000e+00 : f32
      %139 = vector.broadcast %cst_59 : f32 to vector<8x16xf32>
      %140 = arith.maximumf %138, %139 : vector<8x16xf32>
      %c0_60 = arith.constant 0 : index
      %c0_61 = arith.constant 0 : index
      %141 = vector.load %arg8[%c0_60, %c0_61] : memref<40x32xf32, #tpu.memory_space<vmem>>, vector<16x32xf32>
      %cst_62 = arith.constant dense<0.000000e+00> : vector<8x32xf32>
      %142 = tpu.matmul %133, %141, %cst_62 {dimension_numbers = #tpu.dot_dimension_numbers<[1], [0], [0], [1], [0, 0, 1, 1], [], []>} : vector<8x16xf32>, vector<16x32xf32>, vector<8x32xf32> -> vector<8x32xf32>
      %c16 = arith.constant 16 : index
      %c0_63 = arith.constant 0 : index
      %143 = vector.load %arg8[%c16, %c0_63] : memref<40x32xf32, #tpu.memory_space<vmem>>, vector<16x32xf32>
      %cst_64 = arith.constant dense<0.000000e+00> : vector<8x32xf32>
      %144 = tpu.matmul %140, %143, %cst_64 {dimension_numbers = #tpu.dot_dimension_numbers<[1], [0], [0], [1], [0, 0, 1, 1], [], []>} : vector<8x16xf32>, vector<16x32xf32>, vector<8x32xf32> -> vector<8x32xf32>
      %145 = arith.addf %142, %144 : vector<8x32xf32>
      %c32_65 = arith.constant 32 : index
      %c0_66 = arith.constant 0 : index
      %146 = vector.load %arg8[%c32_65, %c0_66] : memref<40x32xf32, #tpu.memory_space<vmem>>, vector<1x32xf32>
      %147 = vector.broadcast %146 : vector<1x32xf32> to vector<8x32xf32>
      %148 = arith.addf %145, %147 : vector<8x32xf32>
      %cst_67 = arith.constant 0.000000e+00 : f32
      %149 = vector.broadcast %cst_67 : f32 to vector<8x32xf32>
      %150 = arith.maximumf %148, %149 : vector<8x32xf32>
      %c0_68 = arith.constant 0 : index
      %c0_69 = arith.constant 0 : index
      %151 = vector.load %arg9[%c0_68, %c0_69] : memref<40x4xf32, #tpu.memory_space<vmem>>, vector<32x4xf32>
      %cst_70 = arith.constant dense<0.000000e+00> : vector<8x4xf32>
      %152 = tpu.matmul %150, %151, %cst_70 {dimension_numbers = #tpu.dot_dimension_numbers<[1], [0], [0], [1], [0, 0, 1, 1], [], []>} : vector<8x32xf32>, vector<32x4xf32>, vector<8x4xf32> -> vector<8x4xf32>
      %c32_71 = arith.constant 32 : index
      %c0_72 = arith.constant 0 : index
      %153 = vector.load %arg9[%c32_71, %c0_72] : memref<40x4xf32, #tpu.memory_space<vmem>>, vector<1x4xf32>
      %154 = vector.broadcast %153 : vector<1x4xf32> to vector<8x4xf32>
      %155 = arith.addf %152, %154 : vector<8x4xf32>
      %c0_73 = arith.constant 0 : index
      %c0_74 = arith.constant 0 : index
      %c0_75 = arith.constant 0 : index
      %156 = vector.load %arg10[%c0_73, %c0_74, %c0_75] : memref<1x8x4xf32, #tpu.memory_space<vmem>>, vector<1x8x4xf32>
      %157 = vector.shape_cast %156 : vector<1x8x4xf32> to vector<8x4xf32>
      %158 = vector.shape_cast %155 : vector<8x4xf32> to vector<1x8x4xf32>
      tpu.vector_store %arg10[%c0_73, %c0_74, %c0_75], %158 {strides = array<i32>} : memref<1x8x4xf32, #tpu.memory_space<vmem>>, vector<1x8x4xf32>,
    } else {
    }
    return
  }
  func.func @transform_0(%arg0: i32, %arg1: i32, %arg2: i32) -> (i32, i32, i32) {
    %c0_i32 = arith.constant 0 : i32
    %c0_i32_0 = arith.constant 0 : i32
    return %arg0, %arg1, %c0_i32 : i32, i32, i32
  }
  func.func @transform_1(%arg0: i32, %arg1: i32, %arg2: i32) -> (i32, i32, i32) {
    %c3_i32 = arith.constant 3 : i32
    %0 = arith.muli %arg0, %c3_i32 : i32
    %1 = arith.addi %0, %arg2 : i32
    %c0_i32 = arith.constant 0 : i32
    %c0_i32_0 = arith.constant 0 : i32
    %c0_i32_1 = arith.constant 0 : i32
    return %1, %c0_i32, %c0_i32_0 : i32, i32, i32
  }
  func.func @transform_2(%arg0: i32, %arg1: i32, %arg2: i32) -> (i32, i32, i32) {
    %c3_i32 = arith.constant 3 : i32
    %0 = arith.muli %arg0, %c3_i32 : i32
    %1 = arith.addi %0, %arg2 : i32
    %c0_i32 = arith.constant 0 : i32
    %c0_i32_0 = arith.constant 0 : i32
    %c0_i32_1 = arith.constant 0 : i32
    return %1, %c0_i32, %c0_i32_0 : i32, i32, i32
  }
  func.func @transform_3(%arg0: i32, %arg1: i32, %arg2: i32) -> (i32, i32) {
    %c0_i32 = arith.constant 0 : i32
    %c0_i32_0 = arith.constant 0 : i32
    %c0_i32_1 = arith.constant 0 : i32
    return %c0_i32, %c0_i32_0 : i32, i32
  }
  func.func @transform_4(%arg0: i32, %arg1: i32, %arg2: i32) -> (i32, i32) {
    %c0_i32 = arith.constant 0 : i32
    %c0_i32_0 = arith.constant 0 : i32
    %c0_i32_1 = arith.constant 0 : i32
    return %c0_i32, %c0_i32_0 : i32, i32
  }
  func.func @transform_5(%arg0: i32, %arg1: i32, %arg2: i32) -> (i32, i32) {
    %c0_i32 = arith.constant 0 : i32
    %c0_i32_0 = arith.constant 0 : i32
    %c0_i32_1 = arith.constant 0 : i32
    return %c0_i32, %c0_i32_0 : i32, i32
  }
  func.func @transform_6(%arg0: i32, %arg1: i32, %arg2: i32) -> (i32, i32) {
    %c0_i32 = arith.constant 0 : i32
    %c0_i32_0 = arith.constant 0 : i32
    %c0_i32_1 = arith.constant 0 : i32
    return %c0_i32, %c0_i32_0 : i32, i32
  }
  func.func @transform_7(%arg0: i32, %arg1: i32, %arg2: i32) -> (i32, i32, i32) {
    %c0_i32 = arith.constant 0 : i32
    %c0_i32_0 = arith.constant 0 : i32
    return %arg0, %arg1, %c0_i32 : i32, i32, i32
  }
}

</mosaic_0001>

<bundles_post_ra>
// kernel: tpu_custom_call.1
= control target key start
LH: loop header
LB: loop body
LE: loop exit
PB: predicated region body
PF: predicated region fallthrough
CT: control target
= control target key end

     0   :  { %s1099_s24 = smov 0   ;;  %s1101_s25 = smov 0   ;;  %s1248_s0 = inlined_call_operand.vmem [shape: f32[2,8,8], index: 0, kind: input, shape index: {}]   ;;  %s1249_s1 = inlined_call_operand.vmem [shape: f32[6,8,16], index: 1, kind: input, shape index: {}]   ;;  %s1250_s2 = inlined_call_operand.vmem [shape: f32[6,64,32], index: 2, kind: input, shape index: {}]   ;;  %s1251_s3 = inlined_call_operand.vmem [shape: f32[48,32], index: 3, kind: input, shape index: {}]   ;;  %s1252_s4 = inlined_call_operand.vmem [shape: f32[40,17], index: 4, kind: input, shape index: {}]   ;;  %s1253_s5 = inlined_call_operand.vmem [shape: f32[40,32], index: 5, kind: input, shape index: {}]   ;;  %s1254_s6 = inlined_call_operand.vmem [shape: f32[40,4], index: 6, kind: input, shape index: {}]   ;;  %s1255_s7 = inlined_call_operand.vmem [shape: f32[2,8,4], index: 7, kind: output, shape index: {}]  }
   0x1   :  { %s1103_s26 = smov 0   ;;  %s1105_s27 = smov 0  }
   0x2   :  { %s1107_s28 = smov 0  }
   0x3 LB: > { %s29_s29 = sadd.s32 1, %s1039_s26  ;;  %s36_s30 = sadd.s32 1, %s1043_s27  ;;  %s1047_s28 = sphi %s1107_s28, %s17_s28   ;;  %s1043_s27 = sphi %s1105_s27, %s1259_s27   ;;  %s1039_s26 = sphi %s1103_s26, %s1258_s26   ;;  %s1035_s25 = sphi %s1101_s25, %s1257_s25   ;;  %s1031_s24 = sphi %s1099_s24, %s1256_s24  }
   0x4   : > { %p30_p0 = scmp.ge.s32.totalorder %s29_s29, 3  ;;  %p916_p1 = scmp.ge.s32.totalorder %s1047_s28, 1 }
   0x5   : > { %p297_p2 = scmp.lt.s32.totalorder %s1047_s28, 7 }
   0x6   : > { %s1261_s29 = smov (%p30_p0, %s29_s29), 0  ;;  %s1263_s30 = smov (!%p30_p0, %s36_s30), %s1043_s27 }
   0x7   : > { %p298_p3 = pnand %p916_p1, %p297_p2  ;;  %p38_p4 = scmp.ge.s32.totalorder %s1263_s30, 2 }
   0x8   : > { %s353_s8 = smul.u32 (!%p298_p3), 3, %s1035_s25  ;;  %p346_p5 = scmp.lt.s32.totalorder (!%p298_p3), %s1035_s25, 1 }
   0x9   : > { %s1265_s30 = smov (%p38_p4, %s1263_s30), 0  ;;  %301 = sbr.rel (%p298_p3) target bundleno = 1701 (0x6a5), region = 48 }
   0xa   : > { %s354_s11 = sadd.s32 (!%p298_p3), %s1031_s24, %s353_s8  ;;  %s1049_s8 = smov (!%p298_p3), 1  }
   0xb   : > { %p355_p6 = scmp.lt.s32.totalorder (!%p298_p3), %s354_s11, 5  ;;  %s1050_s9 = smov (!%p298_p3), 2  }
   0xc   : > { %p927_p7 = scmp.ne.s32.totalorder (!%p298_p3), %s1031_s24, 0 }
   0xe   : > { %v559_v0 = vld [vmem:[%s1251_s3 + $0x28] sm:$0xff]  ;;  %s1267_s25 = smov (!%p346_p5, %s1035_s25), 1  ;;  %s1269_s11 = smov (!%p355_p6, %s354_s11), 5  ;;  %vm379_vm0 = vcmask 64512   ;;  %v558_v3 = vld [vmem:[%s1251_s3 + $0x20] sm:$0xff]  ;;  %vm560_vm1 = vcmask 130048  }
   0xf   : > { %577 = vmatpush.msra.mxu2 %v559_v0  ;;  %s917_s12 = sshll.u32 %s1267_s25, 3  ;;  %s918_s13 = sshll.u32 %s1269_s11, 3  ;;  %v1051_v30 = vmov 4  }
  0x10   : > { %s358_s16 = scalar_lea.vmem %s1249_s1, %s918_s13  ;;  %s352_s19 = scalar_lea.vmem %s1248_s0, %s917_s12  ;;  %989 = vset.pattern.permute.xlu1 %v1051_v30  ;;  %991 = vset.pattern.permute.xlu0 %v1051_v30 }
  0x11   : > { %v378_v1 = vld [vmem:[%s358_s16] sm:$0xff]  ;;  %s1147_s22 = scalar_lea.vmem %s1255_s7, %s917_s12  ;;  %578 = vmatpush.msra.mxu2 %v558_v3  ;;  %990 = vset.pattern.permute.xlu2 %v1051_v30  ;;  %s934_s10 = sshll.u32 %s1269_s11, 6 }
  0x12   : > { %398 = vmatpush.msra.mxu0 %v378_v1  ;;  %v377_v2 = vld [vmem:[%s352_s19] sm:$0xff]  ;;  %s367_s14 = scalar_lea.vmem %s1250_s2, %s934_s10 }
  0x13   : > { %922 = vmatmul.msk.f32.vlgmr.msra.gmra.mxu0 %vm379_vm0, %v377_v2  ;;  %v529_v60 = vld [vmem:[%s367_s14 + $0x38] sm:$0xff]  ;;  %v528_v61 = vld [vmem:[%s367_s14 + $0x30] sm:$0xff]  ;;  %v527_v62 = vld [vmem:[%s367_s14 + $0x28] sm:$0xff]  ;;  %vm530_vm0 = vcmask 523264  }
  0x14   : > { %542 = vmatpush.msra.mxu1 %v529_v60  ;;  %v526_v63 = vld [vmem:[%s367_s14 + $0x20] sm:$0xff]  ;;  %v525_v0 = vld [vmem:[%s367_s14 + $0x18] sm:$0xff]  ;;  %v524_v1 = vld [vmem:[%s367_s14 + $0x10] sm:$0xff] }
  0x15   : > { %v523_v2 = vld [vmem:[%s367_s14 + $0x8] sm:$0xff]  ;;  %v522_v3 = vld [vmem:[%s367_s14] sm:$0xff] }
  0x16   : > { %543 = vmatpush.msra.mxu1 %v528_v61 }
  0x18   : > { %544 = vmatpush.msra.mxu1 %v527_v62 }
  0x1a   : > { %545 = vmatpush.msra.mxu1 %v526_v63 }
  0x1c   : > { %546 = vmatpush.msra.mxu1 %v525_v0 }
  0x1e   : > { %547 = vmatpush.msra.mxu1 %v524_v1 }
  0x20   : > { %548 = vmatpush.msra.mxu1 %v523_v2 }
  0x22   : > { %549 = vmatpush.msra.mxu1 %v522_v3 }
  0x90   : > { %v400_v4 = vpop.f32.mrf.mxu0 }
  0x91   : > { %404 = vrot.lane.b32.xlu0 %v400_v4, %s1049_s8  ;;  %924 = vmatmul.msk.f32.vlgmr.msra.gmra.mxu2 %vm560_vm1, %v400_v4 }
  0x99   : > { %424 = vrot.lane.b32.xlu0 %v400_v4, %s1050_s9 }
 0x103   : > { %v405_v5 = vpop.permute.xlu0 %404 }
 0x104   : > { %993 = vrcp.f32 %v405_v5  ;;  %v418_v9 = vand.u32 2147483648, %v405_v5  ;;  %v416_v11 = vand.u32 2147483647, %v405_v5  ;;  %vm412_vm3 = vweird.f32 %v405_v5 }
 0x106   : > { %v419_v13 = vor.u32 1.1754944e-38, %v418_v9  ;;  %vm417_vm5 = vcmp.eq.f32.partialorder %v416_v11, 8.507059e+37  ;;  %v480_v9 = vlaneseq }
 0x10a   : > { %v994_v6 = vpop.eup %993 }
 0x10b   : > { %v408_v7 = vmul.f32 %v994_v6, %v405_v5  ;;  %vm413_vm2 = vweird.f32 %v994_v6  ;;  %v425_v25 = vpop.permute.xlu0 %424  ;;  %v556_v5 = vld [vmem:[%s1251_s3 + $0x10] sm:$0xff] }
 0x10c   : > { %vm414_vm4 = vmor %vm412_vm3, %vm413_vm2  ;;  %995 = vrcp.f32 %v425_v25  ;;  %v438_v32 = vand.u32 2147483648, %v425_v25  ;;  %vm432_vm8 = vweird.f32 %v425_v25  ;;  %v436_v33 = vand.u32 2147483647, %v425_v25 }
 0x10d   : > { %v409_v8 = vsub.f32 1.0, %v408_v7  ;;  %vm583_vm2 = vcmask 261120  }
 0x10e   : > { %v439_v35 = vor.u32 1.1754944e-38, %v438_v32  ;;  %vm437_vm10 = vcmp.eq.f32.partialorder %v436_v33, 8.507059e+37 }
 0x10f   : > { %v410_v10 = vmul.f32 %v994_v6, %v409_v8 }
 0x111   : > { %v411_v12 = vadd.f32 %v994_v6, %v410_v10 }
 0x112   : > { %v996_v26 = vpop.eup %995 }
 0x113   : > { %v415_v14 = vsel %vm414_vm4, %v994_v6, %v411_v12  ;;  %v428_v27 = vmul.f32 %v996_v26, %v425_v25  ;;  %vm433_vm7 = vweird.f32 %v996_v26  ;;  %v555_v6 = vld [vmem:[%s1251_s3 + $0x8] sm:$0xff] }
 0x114   : > { %v420_v15 = vsel %vm417_vm5, %v419_v13, %v415_v14  ;;  %vm434_vm9 = vmor %vm432_vm8, %vm433_vm7  ;;  %v481_v13 = vand.u32 127, %v480_v9  ;;  %v609_v25 = vld [vmem:[%s1252_s4 + $0x8] sm:$0xff] }
 0x115   : > { %v421_v16 = vmul.f32 %v420_v15, %v400_v4  ;;  %v429_v28 = vsub.f32 1.0, %v428_v27  ;;  %v580_v27 = vpop.f32.mrf.mxu2 }
 0x117   : > { %v422_v17 = vmax.f32 %v421_v16, 0.0  ;;  %v430_v29 = vmul.f32 %v996_v26, %v429_v28 }
 0x119   : > { %v423_v18 = vmin.f32 %v422_v17, 7.0  ;;  %v431_v31 = vadd.f32 %v996_v26, %v430_v29 }
 0x11b   : > { %v444_v19 = vfloor.f32 %v423_v18  ;;  %v435_v34 = vsel %vm434_vm9, %v996_v26, %v431_v31  ;;  %v608_v26 = vld [vmem:[%s1252_s4] sm:$0xff] }
 0x11c   : > { %v440_v36 = vsel %vm437_vm10, %v439_v35, %v435_v34  ;;  %v992_v31 = vld [vmem:[%s1252_s4 + $0x20] ss:$0 sm:$0xff] }
 0x11d   : > { %v446_v20 = vsub.f32 %v423_v18, %v444_v19  ;;  %v936_v21 = vcvt.f32.s32 %v444_v19  ;;  %v441_v37 = vmul.f32 %v440_v36, %v400_v4  ;;  %v557_v4 = vld [vmem:[%s1251_s3 + $0x18] sm:$0xff] }
 0x11e   : > { %599 = vmatpush.msra.mxu3 %v557_v4 }
 0x11f   : > { %474 = vrot.lane.b32.xlu2 %v446_v20, %s1049_s8  ;;  %v452_v22 = vadd.s32 1, %v936_v21  ;;  %v447_v24 = vsub.f32 1.0, %v446_v20  ;;  %v442_v38 = vmax.f32 %v441_v37, 0.0 }
 0x120   : > { %600 = vmatpush.msra.mxu3 %v556_v5 }
 0x121   : > { %vm453_vm6 = vcmp.lt.s32.totalorder %v452_v22, 7  ;;  %v443_v39 = vmin.f32 %v442_v38, 7.0 }
 0x122   : > { %v454_v23 = vsel %vm453_vm6, %v452_v22, 7  ;;  %601 = vmatpush.msra.mxu3 %v555_v6  ;;  %v611_v22 = vld [vmem:[%s1252_s4 + $0x18] sm:$0xff] }
 0x123   : > { %463 = vrot.lane.b32.xlu1 %v454_v23, %s1049_s8  ;;  %v445_v40 = vfloor.f32 %v443_v39  ;;  %v610_v23 = vld [vmem:[%s1252_s4 + $0x10] sm:$0xff]  ;;  %629 = vmatpush.msrb.mxu0 %v611_v22 }
 0x125   : > { %v448_v41 = vsub.f32 %v443_v39, %v445_v40  ;;  %v938_v46 = vcvt.f32.s32 %v445_v40  ;;  %630 = vmatpush.msrb.mxu0 %v610_v23 }
 0x127   : > { %469 = vrot.lane.b32.xlu2 %v447_v24, %s1049_s8  ;;  %v455_v47 = vadd.s32 1, %v938_v46  ;;  %v458_v52 = vmul.u32 8, %v938_v46  ;;  %v449_v53 = vsub.f32 1.0, %v448_v41  ;;  %631 = vmatpush.msrb.mxu0 %v609_v25 }
 0x129   : > { %vm456_vm11 = vcmp.lt.s32.totalorder %v455_v47, 7  ;;  %632 = vmatpush.msrb.mxu0 %v608_v26 }
 0x12a   : > { %v457_v48 = vsel %vm456_vm11, %v455_v47, 7 }
 0x12b   : > { %460 = vrot.lane.b32.xlu1 %v936_v21, %s1049_s8  ;;  %v459_v49 = vmul.u32 8, %v457_v48  ;;  %v554_v21 = vld [vmem:[%s1251_s3] sm:$0xff] }
 0x12c   : > { %602 = vmatpush.msra.mxu3 %v554_v21 }
 0x179   : > { %v475_v42 = vpop.permute.xlu2 %474 }
 0x17a   : > { %v479_v43 = vmul.f32 %v475_v42, %v448_v41  ;;  %v477_v57 = vmul.f32 %v475_v42, %v449_v53 }
 0x17c   : > { %488 = vperm.xlu1 %989, %v479_v43  }
 0x181   : > { %v470_v44 = vpop.permute.xlu2 %469 }
 0x182   : > { %v478_v45 = vmul.f32 %v470_v44, %v448_v41  ;;  %v472_v59 = vmul.f32 %v470_v44, %v449_v53 }
 0x184   : > { %498 = vperm.xlu1 %989, %v478_v45  }
 0x195   : > { %v464_v50 = vpop.permute.xlu1 %463 }
 0x196   : > { %v467_v51 = vadd.s32 %v464_v50, %v459_v49  ;;  %v465_v58 = vadd.s32 %v464_v50, %v458_v52 }
 0x198   : > { %483 = vperm.xlu0 %991, %v467_v51  }
 0x19d   : > { %v461_v54 = vpop.permute.xlu1 %460 }
 0x19e   : > { %v462_v55 = vadd.s32 %v461_v54, %v458_v52  ;;  %v466_v56 = vadd.s32 %v461_v54, %v459_v49 }
 0x1a0   : > { %493 = vperm.xlu2 %990, %v466_v56   ;;  %513 = vperm.xlu1 %989, %v462_v55  }
 0x1a1   : > { %508 = vperm.xlu0 %991, %v477_v57  }
 0x1a8   : > { %503 = vperm.xlu2 %990, %v465_v58  }
 0x1b0   : > { %518 = vperm.xlu2 %990, %v472_v59  }
 0x1ee   : > { %v489_v7 = vpop.permute.xlu1 %488 }
 0x1f6   : > { %v499_v10 = vpop.permute.xlu1 %498 }
 0x1fa   : > { %v494_v8 = vpop.permute.xlu2 %493 }
 0x1fb   : > { %vm495_vm13 = vcmp.eq.s32.totalorder %v481_v13, %v494_v8 }
 0x202   : > { %v504_v11 = vpop.permute.xlu2 %503 }
 0x203   : > { %vm505_vm14 = vcmp.eq.s32.totalorder %v481_v13, %v504_v11 }
 0x20a   : > { %v484_v12 = vpop.permute.xlu0 %483  ;;  %v519_v18 = vpop.permute.xlu2 %518 }
 0x20b   : > { %vm485_vm12 = vcmp.eq.s32.totalorder %v481_v13, %v484_v12 }
 0x20c   : > { %v491_v14 = vsel %vm485_vm12, %v489_v7, 0.0 }
 0x20d   : > { %v501_v16 = vsel %vm495_vm13, %v499_v10, %v491_v14 }
 0x212   : > { %v514_v15 = vpop.permute.xlu1 %513 }
 0x213   : > { %vm515_vm15 = vcmp.eq.s32.totalorder %v481_v13, %v514_v15  ;;  %v509_v17 = vpop.permute.xlu0 %508 }
 0x214   : > { %v511_v19 = vsel %vm505_vm14, %v509_v17, %v501_v16 }
 0x215   : > { %v521_v20 = vsel %vm515_vm15, %v519_v18, %v511_v19 }
 0x216   : > { %923 = vmatmul.msk.f32.vlgmr.msra.gmra.mxu1 %vm530_vm0, %v521_v20 }
 0x293   : > { %v551_v24 = vpop.f32.mrf.mxu1 }
 0x294   : > { %925 = vmatmul.msk.f32.vlgmr.msra.gmra.mxu3 %vm583_vm2, %v551_v24 }
 0x317   : > { %v604_v28 = vpop.f32.mrf.mxu3 }
 0x318   : > { %v605_v29 = vadd.f32 %v604_v28, %v580_v27 }
 0x31a   : > { %v607_v30 = vmax.f32 %v605_v29, 0.0 }
 0x31c   : > { %926 = vmatmul.msk.f32.vlgmr.msrb.gmra.mxu0 %vm583_vm2, %v607_v30 }
 0x396   : > { %640 = sbr.rel (%p927_p7) target bundleno = 928 (0x3a0), region = 52 }
 0x399   : > { %v634_v32 = vpop.f32.mrf.mxu0 }
 0x39a   : > { %v635_v33 = vadd.f32 %v992_v31, %v634_v32 }
 0x39b   : > { %vm641_vm3 = vcmask 7168   ;;  %v1052_v34 = vmov -inf   ;;  %v1053_v35 = vmov 0.0  }
 0x39c   : > { %642 = vst.msk [vmem:[#allocation2] sm:$0xff] %vm641_vm3, %v1052_v34 }
 0x39d   : > { %643 = vst.msk [vmem:[#allocation3] sm:$0xff] %vm641_vm3, %v1053_v35 }
 0x39e   : > { %644 = vst.msk [vmem:[#allocation4] sm:$0xff] %vm560_vm1, %v1053_v35 }
 0x39f   : > { %645 = vst.msk [vmem:[#allocation5] sm:$0xff] %vm560_vm1, %v1053_v35 }
 0x3a0 PF: > { %s1054_s16 = smov 112   ;;  %v1055_v36 = vmov 0   ;;  %vm669_vm4 = vcmask 7168   ;;  %s1056_s17 = smov 16   ;;  %v1057_v43 = vmov 16   ;;  %v687_v53 = vmul.f32 %v635_v33, %v635_v33 }
 0x3a1   : > { %648 = vrot.lane.b32.xlu0 %v635_v33, %s1054_s16  ;;  %997 = vset.pattern.permute.xlu1 %v1055_v36  ;;  %p928_p8 = scmp.ne.s32.totalorder %s1031_s24, 2 }
 0x3a2   : > { %999 = vset.pattern.permute.xlu0 %v1057_v43 }
 0x3a3   : > { %v646_v37 = vld [vmem:[#allocation2] sm:$0xff] }
 0x3a4   : > { %v662_v48 = vld [vmem:[#allocation3] sm:$0xff] }
 0x3a5   : > { %v671_v54 = vld [vmem:[#allocation4] sm:$0xff] }
 0x3a6   : > { %v685_v55 = vld [vmem:[#allocation5] sm:$0xff] }
 0x413   : > { %v649_v38 = vpop.permute.xlu0 %648 }
 0x414   : > { %v651_v39 = vmax.f32 %v646_v37, %v649_v38 }
 0x416   : > { %v652_v40 = vsub.f32 %v646_v37, %v651_v39  ;;  %691 = vst.msk [vmem:[#allocation2] sm:$0xff] %vm669_vm4, %v651_v39  ;;  %656 = vrot.lane.b32.xlu0 %v651_v39, %s1056_s17 }
 0x418   : > { %v653_v41 = vmul.f32 1.442695, %v652_v40 }
 0x41a   : > { %1000 = vpow2.f32 %v653_v41 }
 0x420   : > { %v1001_v42 = vpop.eup %1000 }
 0x421   : > { %674 = vperm.xlu1 %997, %v1001_v42   ;;  %v663_v49 = vmul.f32 %v1001_v42, %v662_v48 }
 0x429   : > { %998 = vset.pattern.permute.xlu1 %v1057_v43 }
 0x488   : > { %v657_v44 = vpop.permute.xlu0 %656 }
 0x489   : > { %v659_v45 = vsub.f32 %v635_v33, %v657_v44 }
 0x48b   : > { %v660_v46 = vmul.f32 1.442695, %v659_v45 }
 0x48d   : > { %1002 = vpow2.f32 %v660_v46 }
 0x493   : > { %v1003_v47 = vpop.eup %1002  ;;  %v675_v52 = vpop.permute.xlu1 %674 }
 0x494   : > { %665 = vrot.lane.b32.xlu2 %v1003_v47, %s1054_s16  ;;  %679 = vperm.xlu1 %998, %v1003_v47   ;;  %v677_v57 = vmul.f32 %v675_v52, %v671_v54  ;;  %v686_v58 = vmul.f32 %v685_v55, %v675_v52 }
 0x4ee   : > { %v666_v50 = vpop.permute.xlu2 %665 }
 0x4ef   : > { %v668_v51 = vadd.f32 %v666_v50, %v663_v49 }
 0x4f1   : > { %670 = vst.msk [vmem:[#allocation3] sm:$0xff] %vm669_vm4, %v668_v51 }
 0x506   : > { %v680_v56 = vpop.permute.xlu1 %679 }
 0x507   : > { %v682_v59 = vmul.f32 %v680_v56, %v635_v33  ;;  %v688_v60 = vmul.f32 %v687_v53, %v680_v56 }
 0x508   : > { %695 = sbr.rel (%p928_p8) target bundleno = 1701 (0x6a5), region = 56 }
 0x509   : > { %v683_v61 = vadd.f32 %v682_v59, %v677_v57  ;;  %v689_v62 = vadd.f32 %v688_v60, %v686_v58 }
 0x50b   : > { %684 = vst.msk [vmem:[#allocation4] sm:$0xff] %vm560_vm1, %v683_v61 }
 0x50c   : > { %690 = vst.msk [vmem:[#allocation5] sm:$0xff] %vm560_vm1, %v689_v62 }
 0x50d   : > { %v696_v63 = vld [vmem:[#allocation3] sm:$0xff]  ;;  %v1058_v1 = vmov 0   ;;  %v723_v12 = vld [vmem:[%s1253_s5] sm:$0xff]  ;;  %v726_v13 = vld [vmem:[%s1253_s5 + $0x18] sm:$0xff] }
 0x50e   : > { %v724_v0 = vld [vmem:[%s1253_s5 + $0x8] sm:$0xff]  ;;  %1004 = vset.pattern.permute.xlu0 %v1058_v1  ;;  %1007 = vrcp.f32 %v696_v63  ;;  %v708_v4 = vand.u32 2147483648, %v696_v63  ;;  %vm702_vm5 = vweird.f32 %v696_v63  ;;  %v706_v6 = vand.u32 2147483647, %v696_v63  ;;  %v725_v14 = vld [vmem:[%s1253_s5 + $0x10] sm:$0xff]  ;;  %744 = vmatpush.msra.mxu0 %v726_v13  ;;  %v780_v23 = vld [vmem:[%s1254_s6 + $0x18] sm:$0xff] }
 0x50f   : > { %767 = vmatpush.msra.mxu1 %v724_v0  ;;  %798 = vmatpush.msra.mxu2 %v780_v23  ;;  %v779_v24 = vld [vmem:[%s1254_s6 + $0x10] sm:$0xff]  ;;  %v778_v25 = vld [vmem:[%s1254_s6 + $0x8] sm:$0xff]  ;;  %v777_v26 = vld [vmem:[%s1254_s6] sm:$0xff] }
 0x510   : > { %v709_v8 = vor.u32 1.1754944e-38, %v708_v4  ;;  %vm707_vm8 = vcmp.eq.f32.partialorder %v706_v6, 8.507059e+37  ;;  %745 = vmatpush.msra.mxu0 %v725_v14  ;;  %v1005_v27 = vld [vmem:[%s1253_s5 + $0x20] ss:$0 sm:$0xff] }
 0x511   : > { %768 = vmatpush.msra.mxu1 %v723_v12  ;;  %799 = vmatpush.msra.mxu2 %v779_v24  ;;  %v1006_v33 = vld [vmem:[%s1254_s6 + $0x20] ss:$0 sm:$0xff] }
 0x512   : > { %v711_v15 = vld [vmem:[#allocation4] sm:$0xff] }
 0x513   : > { %v718_v16 = vld [vmem:[#allocation5] sm:$0xff]  ;;  %800 = vmatpush.msra.mxu2 %v778_v25 }
 0x514   : > { %v1008_v2 = vpop.eup %1007 }
 0x515   : > { %v698_v3 = vmul.f32 %v1008_v2, %v696_v63  ;;  %vm703_vm6 = vweird.f32 %v1008_v2  ;;  %801 = vmatpush.msra.mxu2 %v777_v26 }
 0x516   : > { %vm704_vm7 = vmor %vm702_vm5, %vm703_vm6 }
 0x517   : > { %v699_v5 = vsub.f32 1.0, %v698_v3 }
 0x519   : > { %v700_v7 = vmul.f32 %v1008_v2, %v699_v5 }
 0x51b   : > { %v701_v9 = vadd.f32 %v1008_v2, %v700_v7 }
 0x51d   : > { %v705_v10 = vsel %vm704_vm7, %v1008_v2, %v701_v9 }
 0x51e   : > { %v710_v11 = vsel %vm707_vm8, %v709_v8, %v705_v10 }
 0x51f   : > { %714 = vperm.xlu0 %1004, %v710_v11  }
 0x591   : > { %v715_v17 = vpop.permute.xlu0 %714 }
 0x592   : > { %v717_v18 = vmul.f32 %v715_v17, %v711_v15  ;;  %v719_v19 = vmul.f32 %v718_v16, %v715_v17 }
 0x594   : > { %v720_v20 = vmul.f32 %v717_v18, %v717_v18  ;;  %930 = vmatmul.msk.f32.vlgmr.msra.gmra.mxu1 %vm560_vm1, %v717_v18 }
 0x596   : > { %v721_v21 = vsub.f32 %v719_v19, %v720_v20 }
 0x598   : > { %v722_v22 = vmax.f32 %v721_v21, 0.0 }
 0x59a   : > { %929 = vmatmul.msk.f32.vlgmr.msra.gmra.mxu0 %vm560_vm1, %v722_v22  ;;  %vm806_vm1 = vcmask 31744  }
 0x611   : > { %v770_v28 = vpop.f32.mrf.mxu1 }
 0x617   : > { %v747_v29 = vpop.f32.mrf.mxu0 }
 0x618   : > { %v771_v30 = vadd.f32 %v770_v28, %v747_v29 }
 0x61a   : > { %v775_v31 = vadd.f32 %v1005_v27, %v771_v30 }
 0x61c   : > { %v776_v32 = vmax.f32 %v775_v31, 0.0 }
 0x61e   : > { %931 = vmatmul.msk.f32.vlgmr.msra.gmra.mxu2 %vm583_vm2, %v776_v32 }
 0x6a1   : > { %v803_v34 = vpop.f32.mrf.mxu2 }
 0x6a2   : > { %v804_v35 = vadd.f32 %v1006_v33, %v803_v34 }
 0x6a4   : > { %807 = vst.msk [vmem:[%s1147_s22] sm:$0xff] %vm806_vm1, %v804_v35 }
 0x6a5 PF: > { %s17_s28 = sadd.s32 1, %s1047_s28   ;;  %s1256_s24 = smov %s1039_s26 }
 0x6a6   : > { %p14_p9 = scmp.ge.s32.totalorder %s17_s28, 8   ;;  %s1257_s25 = smov %s1043_s27 }
 0x6a7   : > { %s1258_s26 = smov %s1261_s29  ;;  %s1259_s27 = smov %s1265_s30 }
 0x6a8   :  { %16 = sbr.rel (!%p14_p9) target bundleno = 3 (0x3), region = 92 }

// kernel: tpu_custom_call.1
= control target key start
LH: loop header
LB: loop body
LE: loop exit
PB: predicated region body
PF: predicated region fallthrough
CT: control target
= control target key end

     0   :  { %s1099_s24 = smov 0   ;;  %s1101_s25 = smov 0   ;;  %s1248_s0 = inlined_call_operand.vmem [shape: f32[2,8,8], index: 0, kind: input, shape index: {}]   ;;  %s1249_s1 = inlined_call_operand.vmem [shape: f32[6,8,16], index: 1, kind: input, shape index: {}]   ;;  %s1250_s2 = inlined_call_operand.vmem [shape: f32[6,64,32], index: 2, kind: input, shape index: {}]   ;;  %s1251_s3 = inlined_call_operand.vmem [shape: f32[48,32], index: 3, kind: input, shape index: {}]   ;;  %s1252_s4 = inlined_call_operand.vmem [shape: f32[40,17], index: 4, kind: input, shape index: {}]   ;;  %s1253_s5 = inlined_call_operand.vmem [shape: f32[40,32], index: 5, kind: input, shape index: {}]   ;;  %s1254_s6 = inlined_call_operand.vmem [shape: f32[40,4], index: 6, kind: input, shape index: {}]   ;;  %s1255_s7 = inlined_call_operand.vmem [shape: f32[2,8,4], index: 7, kind: output, shape index: {}]  }
   0x1   :  { %s1103_s26 = smov 0   ;;  %s1105_s27 = smov 0  }
   0x2   :  { %s1107_s28 = smov 0  }
   0x3 LB: > { %s29_s29 = sadd.s32 1, %s1039_s26  ;;  %s36_s30 = sadd.s32 1, %s1043_s27  ;;  %s1047_s28 = sphi %s1107_s28, %s17_s28   ;;  %s1043_s27 = sphi %s1105_s27, %s1259_s27   ;;  %s1039_s26 = sphi %s1103_s26, %s1258_s26   ;;  %s1035_s25 = sphi %s1101_s25, %s1257_s25   ;;  %s1031_s24 = sphi %s1099_s24, %s1256_s24  }
   0x4   : > { %p30_p0 = scmp.ge.s32.totalorder %s29_s29, 3  ;;  %p916_p1 = scmp.ge.s32.totalorder %s1047_s28, 1 }
   0x5   : > { %p297_p2 = scmp.lt.s32.totalorder %s1047_s28, 7 }
   0x6   : > { %s1261_s29 = smov (%p30_p0, %s29_s29), 0  ;;  %s1263_s30 = smov (!%p30_p0, %s36_s30), %s1043_s27 }
   0x7   : > { %p298_p3 = pnand %p916_p1, %p297_p2  ;;  %p38_p4 = scmp.ge.s32.totalorder %s1263_s30, 2 }
   0x8   : > { %s353_s8 = smul.u32 (!%p298_p3), 3, %s1035_s25  ;;  %p346_p5 = scmp.lt.s32.totalorder (!%p298_p3), %s1035_s25, 1 }
   0x9   : > { %s1265_s30 = smov (%p38_p4, %s1263_s30), 0  ;;  %301 = sbr.rel (%p298_p3) target bundleno = 1701 (0x6a5), region = 48 }
   0xa   : > { %s354_s11 = sadd.s32 (!%p298_p3), %s1031_s24, %s353_s8  ;;  %s1049_s8 = smov (!%p298_p3), 1  }
   0xb   : > { %p355_p6 = scmp.lt.s32.totalorder (!%p298_p3), %s354_s11, 5  ;;  %s1050_s9 = smov (!%p298_p3), 2  }
   0xc   : > { %p927_p7 = scmp.ne.s32.totalorder (!%p298_p3), %s1031_s24, 0 }
   0xe   : > { %v559_v0 = vld [vmem:[%s1251_s3 + $0x28] sm:$0xff]  ;;  %s1267_s25 = smov (!%p346_p5, %s1035_s25), 1  ;;  %s1269_s11 = smov (!%p355_p6, %s354_s11), 5  ;;  %vm379_vm0 = vcmask 64512   ;;  %v558_v3 = vld [vmem:[%s1251_s3 + $0x20] sm:$0xff]  ;;  %vm560_vm1 = vcmask 130048  }
   0xf   : > { %577 = vmatpush.msra.mxu2 %v559_v0  ;;  %s917_s12 = sshll.u32 %s1267_s25, 3  ;;  %s918_s13 = sshll.u32 %s1269_s11, 3  ;;  %v1051_v30 = vmov 4  }
  0x10   : > { %s358_s16 = scalar_lea.vmem %s1249_s1, %s918_s13  ;;  %s352_s19 = scalar_lea.vmem %s1248_s0, %s917_s12  ;;  %989 = vset.pattern.permute.xlu1 %v1051_v30  ;;  %991 = vset.pattern.permute.xlu0 %v1051_v30 }
  0x11   : > { %v378_v1 = vld [vmem:[%s358_s16] sm:$0xff]  ;;  %s1147_s22 = scalar_lea.vmem %s1255_s7, %s917_s12  ;;  %578 = vmatpush.msra.mxu2 %v558_v3  ;;  %990 = vset.pattern.permute.xlu2 %v1051_v30  ;;  %s934_s10 = sshll.u32 %s1269_s11, 6 }
  0x12   : > { %398 = vmatpush.msra.mxu0 %v378_v1  ;;  %v377_v2 = vld [vmem:[%s352_s19] sm:$0xff]  ;;  %s367_s14 = scalar_lea.vmem %s1250_s2, %s934_s10 }
  0x13   : > { %922 = vmatmul.msk.f32.vlgmr.msra.gmra.mxu0 %vm379_vm0, %v377_v2  ;;  %v529_v60 = vld [vmem:[%s367_s14 + $0x38] sm:$0xff]  ;;  %v528_v61 = vld [vmem:[%s367_s14 + $0x30] sm:$0xff]  ;;  %v527_v62 = vld [vmem:[%s367_s14 + $0x28] sm:$0xff]  ;;  %vm530_vm0 = vcmask 523264  }
  0x14   : > { %542 = vmatpush.msra.mxu1 %v529_v60  ;;  %v526_v63 = vld [vmem:[%s367_s14 + $0x20] sm:$0xff]  ;;  %v525_v0 = vld [vmem:[%s367_s14 + $0x18] sm:$0xff]  ;;  %v524_v1 = vld [vmem:[%s367_s14 + $0x10] sm:$0xff] }
  0x15   : > { %v523_v2 = vld [vmem:[%s367_s14 + $0x8] sm:$0xff]  ;;  %v522_v3 = vld [vmem:[%s367_s14] sm:$0xff] }
  0x16   : > { %543 = vmatpush.msra.mxu1 %v528_v61 }
  0x18   : > { %544 = vmatpush.msra.mxu1 %v527_v62 }
  0x1a   : > { %545 = vmatpush.msra.mxu1 %v526_v63 }
  0x1c   : > { %546 = vmatpush.msra.mxu1 %v525_v0 }
  0x1e   : > { %547 = vmatpush.msra.mxu1 %v524_v1 }
  0x20   : > { %548 = vmatpush.msra.mxu1 %v523_v2 }
  0x22   : > { %549 = vmatpush.msra.mxu1 %v522_v3 }
  0x90   : > { %v400_v4 = vpop.f32.mrf.mxu0 }
  0x91   : > { %404 = vrot.lane.b32.xlu0 %v400_v4, %s1049_s8  ;;  %924 = vmatmul.msk.f32.vlgmr.msra.gmra.mxu2 %vm560_vm1, %v400_v4 }
  0x99   : > { %424 = vrot.lane.b32.xlu0 %v400_v4, %s1050_s9 }
 0x103   : > { %v405_v5 = vpop.permute.xlu0 %404 }
 0x104   : > { %993 = vrcp.f32 %v405_v5  ;;  %v418_v9 = vand.u32 2147483648, %v405_v5  ;;  %v416_v11 = vand.u32 2147483647, %v405_v5  ;;  %vm412_vm3 = vweird.f32 %v405_v5 }
 0x106   : > { %v419_v13 = vor.u32 1.1754944e-38, %v418_v9  ;;  %vm417_vm5 = vcmp.eq.f32.partialorder %v416_v11, 8.507059e+37  ;;  %v480_v9 = vlaneseq }
 0x10a   : > { %v994_v6 = vpop.eup %993 }
 0x10b   : > { %v408_v7 = vmul.f32 %v994_v6, %v405_v5  ;;  %vm413_vm2 = vweird.f32 %v994_v6  ;;  %v425_v25 = vpop.permute.xlu0 %424  ;;  %v556_v5 = vld [vmem:[%s1251_s3 + $0x10] sm:$0xff] }
 0x10c   : > { %vm414_vm4 = vmor %vm412_vm3, %vm413_vm2  ;;  %995 = vrcp.f32 %v425_v25  ;;  %v438_v32 = vand.u32 2147483648, %v425_v25  ;;  %vm432_vm8 = vweird.f32 %v425_v25  ;;  %v436_v33 = vand.u32 2147483647, %v425_v25 }
 0x10d   : > { %v409_v8 = vsub.f32 1.0, %v408_v7  ;;  %vm583_vm2 = vcmask 261120  }
 0x10e   : > { %v439_v35 = vor.u32 1.1754944e-38, %v438_v32  ;;  %vm437_vm10 = vcmp.eq.f32.partialorder %v436_v33, 8.507059e+37 }
 0x10f   : > { %v410_v10 = vmul.f32 %v994_v6, %v409_v8 }
 0x111   : > { %v411_v12 = vadd.f32 %v994_v6, %v410_v10 }
 0x112   : > { %v996_v26 = vpop.eup %995 }
 0x113   : > { %v415_v14 = vsel %vm414_vm4, %v994_v6, %v411_v12  ;;  %v428_v27 = vmul.f32 %v996_v26, %v425_v25  ;;  %vm433_vm7 = vweird.f32 %v996_v26  ;;  %v555_v6 = vld [vmem:[%s1251_s3 + $0x8] sm:$0xff] }
 0x114   : > { %v420_v15 = vsel %vm417_vm5, %v419_v13, %v415_v14  ;;  %vm434_vm9 = vmor %vm432_vm8, %vm433_vm7  ;;  %v481_v13 = vand.u32 127, %v480_v9  ;;  %v609_v25 = vld [vmem:[%s1252_s4 + $0x8] sm:$0xff] }
 0x115   : > { %v421_v16 = vmul.f32 %v420_v15, %v400_v4  ;;  %v429_v28 = vsub.f32 1.0, %v428_v27  ;;  %v580_v27 = vpop.f32.mrf.mxu2 }
 0x117   : > { %v422_v17 = vmax.f32 %v421_v16, 0.0  ;;  %v430_v29 = vmul.f32 %v996_v26, %v429_v28 }
 0x119   : > { %v423_v18 = vmin.f32 %v422_v17, 7.0  ;;  %v431_v31 = vadd.f32 %v996_v26, %v430_v29 }
 0x11b   : > { %v444_v19 = vfloor.f32 %v423_v18  ;;  %v435_v34 = vsel %vm434_vm9, %v996_v26, %v431_v31  ;;  %v608_v26 = vld [vmem:[%s1252_s4] sm:$0xff] }
 0x11c   : > { %v440_v36 = vsel %vm437_vm10, %v439_v35, %v435_v34  ;;  %v992_v31 = vld [vmem:[%s1252_s4 + $0x20] ss:$0 sm:$0xff] }
 0x11d   : > { %v446_v20 = vsub.f32 %v423_v18, %v444_v19  ;;  %v936_v21 = vcvt.f32.s32 %v444_v19  ;;  %v441_v37 = vmul.f32 %v440_v36, %v400_v4  ;;  %v557_v4 = vld [vmem:[%s1251_s3 + $0x18] sm:$0xff] }
 0x11e   : > { %599 = vmatpush.msra.mxu3 %v557_v4 }
 0x11f   : > { %474 = vrot.lane.b32.xlu2 %v446_v20, %s1049_s8  ;;  %v452_v22 = vadd.s32 1, %v936_v21  ;;  %v447_v24 = vsub.f32 1.0, %v446_v20  ;;  %v442_v38 = vmax.f32 %v441_v37, 0.0 }
 0x120   : > { %600 = vmatpush.msra.mxu3 %v556_v5 }
 0x121   : > { %vm453_vm6 = vcmp.lt.s32.totalorder %v452_v22, 7  ;;  %v443_v39 = vmin.f32 %v442_v38, 7.0 }
 0x122   : > { %v454_v23 = vsel %vm453_vm6, %v452_v22, 7  ;;  %601 = vmatpush.msra.mxu3 %v555_v6  ;;  %v611_v22 = vld [vmem:[%s1252_s4 + $0x18] sm:$0xff] }
 0x123   : > { %463 = vrot.lane.b32.xlu1 %v454_v23, %s1049_s8  ;;  %v445_v40 = vfloor.f32 %v443_v39  ;;  %v610_v23 = vld [vmem:[%s1252_s4 + $0x10] sm:$0xff]  ;;  %629 = vmatpush.msrb.mxu0 %v611_v22 }
 0x125   : > { %v448_v41 = vsub.f32 %v443_v39, %v445_v40  ;;  %v938_v46 = vcvt.f32.s32 %v445_v40  ;;  %630 = vmatpush.msrb.mxu0 %v610_v23 }
 0x127   : > { %469 = vrot.lane.b32.xlu2 %v447_v24, %s1049_s8  ;;  %v455_v47 = vadd.s32 1, %v938_v46  ;;  %v458_v52 = vmul.u32 8, %v938_v46  ;;  %v449_v53 = vsub.f32 1.0, %v448_v41  ;;  %631 = vmatpush.msrb.mxu0 %v609_v25 }
 0x129   : > { %vm456_vm11 = vcmp.lt.s32.totalorder %v455_v47, 7  ;;  %632 = vmatpush.msrb.mxu0 %v608_v26 }
 0x12a   : > { %v457_v48 = vsel %vm456_vm11, %v455_v47, 7 }
 0x12b   : > { %460 = vrot.lane.b32.xlu1 %v936_v21, %s1049_s8  ;;  %v459_v49 = vmul.u32 8, %v457_v48  ;;  %v554_v21 = vld [vmem:[%s1251_s3] sm:$0xff] }
 0x12c   : > { %602 = vmatpush.msra.mxu3 %v554_v21 }
 0x179   : > { %v475_v42 = vpop.permute.xlu2 %474 }
 0x17a   : > { %v479_v43 = vmul.f32 %v475_v42, %v448_v41  ;;  %v477_v57 = vmul.f32 %v475_v42, %v449_v53 }
 0x17c   : > { %488 = vperm.xlu1 %989, %v479_v43  }
 0x181   : > { %v470_v44 = vpop.permute.xlu2 %469 }
 0x182   : > { %v478_v45 = vmul.f32 %v470_v44, %v448_v41  ;;  %v472_v59 = vmul.f32 %v470_v44, %v449_v53 }
 0x184   : > { %498 = vperm.xlu1 %989, %v478_v45  }
 0x195   : > { %v464_v50 = vpop.permute.xlu1 %463 }
 0x196   : > { %v467_v51 = vadd.s32 %v464_v50, %v459_v49  ;;  %v465_v58 = vadd.s32 %v464_v50, %v458_v52 }
 0x198   : > { %483 = vperm.xlu0 %991, %v467_v51  }
 0x19d   : > { %v461_v54 = vpop.permute.xlu1 %460 }
 0x19e   : > { %v462_v55 = vadd.s32 %v461_v54, %v458_v52  ;;  %v466_v56 = vadd.s32 %v461_v54, %v459_v49 }
 0x1a0   : > { %493 = vperm.xlu2 %990, %v466_v56   ;;  %513 = vperm.xlu1 %989, %v462_v55  }
 0x1a1   : > { %508 = vperm.xlu0 %991, %v477_v57  }
 0x1a8   : > { %503 = vperm.xlu2 %990, %v465_v58  }
 0x1b0   : > { %518 = vperm.xlu2 %990, %v472_v59  }
 0x1ee   : > { %v489_v7 = vpop.permute.xlu1 %488 }
 0x1f6   : > { %v499_v10 = vpop.permute.xlu1 %498 }
 0x1fa   : > { %v494_v8 = vpop.permute.xlu2 %493 }
 0x1fb   : > { %vm495_vm13 = vcmp.eq.s32.totalorder %v481_v13, %v494_v8 }
 0x202   : > { %v504_v11 = vpop.permute.xlu2 %503 }
 0x203   : > { %vm505_vm14 = vcmp.eq.s32.totalorder %v481_v13, %v504_v11 }
 0x20a   : > { %v484_v12 = vpop.permute.xlu0 %483  ;;  %v519_v18 = vpop.permute.xlu2 %518 }
 0x20b   : > { %vm485_vm12 = vcmp.eq.s32.totalorder %v481_v13, %v484_v12 }
 0x20c   : > { %v491_v14 = vsel %vm485_vm12, %v489_v7, 0.0 }
 0x20d   : > { %v501_v16 = vsel %vm495_vm13, %v499_v10, %v491_v14 }
 0x212   : > { %v514_v15 = vpop.permute.xlu1 %513 }
 0x213   : > { %vm515_vm15 = vcmp.eq.s32.totalorder %v481_v13, %v514_v15  ;;  %v509_v17 = vpop.permute.xlu0 %508 }
 0x214   : > { %v511_v19 = vsel %vm505_vm14, %v509_v17, %v501_v16 }
 0x215   : > { %v521_v20 = vsel %vm515_vm15, %v519_v18, %v511_v19 }
 0x216   : > { %923 = vmatmul.msk.f32.vlgmr.msra.gmra.mxu1 %vm530_vm0, %v521_v20 }
 0x293   : > { %v551_v24 = vpop.f32.mrf.mxu1 }
 0x294   : > { %925 = vmatmul.msk.f32.vlgmr.msra.gmra.mxu3 %vm583_vm2, %v551_v24 }
 0x317   : > { %v604_v28 = vpop.f32.mrf.mxu3 }
 0x318   : > { %v605_v29 = vadd.f32 %v604_v28, %v580_v27 }
 0x31a   : > { %v607_v30 = vmax.f32 %v605_v29, 0.0 }
 0x31c   : > { %926 = vmatmul.msk.f32.vlgmr.msrb.gmra.mxu0 %vm583_vm2, %v607_v30 }
 0x396   : > { %640 = sbr.rel (%p927_p7) target bundleno = 928 (0x3a0), region = 52 }
 0x399   : > { %v634_v32 = vpop.f32.mrf.mxu0 }
 0x39a   : > { %v635_v33 = vadd.f32 %v992_v31, %v634_v32 }
 0x39b   : > { %vm641_vm3 = vcmask 7168   ;;  %v1052_v34 = vmov -inf   ;;  %v1053_v35 = vmov 0.0  }
 0x39c   : > { %642 = vst.msk [vmem:[#allocation2] sm:$0xff] %vm641_vm3, %v1052_v34 }
 0x39d   : > { %643 = vst.msk [vmem:[#allocation3] sm:$0xff] %vm641_vm3, %v1053_v35 }
 0x39e   : > { %644 = vst.msk [vmem:[#allocation4] sm:$0xff] %vm560_vm1, %v1053_v35 }
 0x39f   : > { %645 = vst.msk [vmem:[#allocation5] sm:$0xff] %vm560_vm1, %v1053_v35 }
 0x3a0 PF: > { %s1054_s16 = smov 112   ;;  %v1055_v36 = vmov 0   ;;  %vm669_vm4 = vcmask 7168   ;;  %s1056_s17 = smov 16   ;;  %v1057_v43 = vmov 16   ;;  %v687_v53 = vmul.f32 %v635_v33, %v635_v33 }
 0x3a1   : > { %648 = vrot.lane.b32.xlu0 %v635_v33, %s1054_s16  ;;  %997 = vset.pattern.permute.xlu1 %v1055_v36  ;;  %p928_p8 = scmp.ne.s32.totalorder %s1031_s24, 2 }
 0x3a2   : > { %999 = vset.pattern.permute.xlu0 %v1057_v43 }
 0x3a3   : > { %v646_v37 = vld [vmem:[#allocation2] sm:$0xff] }
 0x3a4   : > { %v662_v48 = vld [vmem:[#allocation3] sm:$0xff] }
 0x3a5   : > { %v671_v54 = vld [vmem:[#allocation4] sm:$0xff] }
 0x3a6   : > { %v685_v55 = vld [vmem:[#allocation5] sm:$0xff] }
 0x413   : > { %v649_v38 = vpop.permute.xlu0 %648 }
 0x414   : > { %v651_v39 = vmax.f32 %v646_v37, %v649_v38 }
 0x416   : > { %v652_v40 = vsub.f32 %v646_v37, %v651_v39  ;;  %691 = vst.msk [vmem:[#allocation2] sm:$0xff] %vm669_vm4, %v651_v39  ;;  %656 = vrot.lane.b32.xlu0 %v651_v39, %s1056_s17 }
 0x418   : > { %v653_v41 = vmul.f32 1.442695, %v652_v40 }
 0x41a   : > { %1000 = vpow2.f32 %v653_v41 }
 0x420   : > { %v1001_v42 = vpop.eup %1000 }
 0x421   : > { %674 = vperm.xlu1 %997, %v1001_v42   ;;  %v663_v49 = vmul.f32 %v1001_v42, %v662_v48 }
 0x429   : > { %998 = vset.pattern.permute.xlu1 %v1057_v43 }
 0x488   : > { %v657_v44 = vpop.permute.xlu0 %656 }
 0x489   : > { %v659_v45 = vsub.f32 %v635_v33, %v657_v44 }
 0x48b   : > { %v660_v46 = vmul.f32 1.442695, %v659_v45 }
 0x48d   : > { %1002 = vpow2.f32 %v660_v46 }
 0x493   : > { %v1003_v47 = vpop.eup %1002  ;;  %v675_v52 = vpop.permute.xlu1 %674 }
 0x494   : > { %665 = vrot.lane.b32.xlu2 %v1003_v47, %s1054_s16  ;;  %679 = vperm.xlu1 %998, %v1003_v47   ;;  %v677_v57 = vmul.f32 %v675_v52, %v671_v54  ;;  %v686_v58 = vmul.f32 %v685_v55, %v675_v52 }
 0x4ee   : > { %v666_v50 = vpop.permute.xlu2 %665 }
 0x4ef   : > { %v668_v51 = vadd.f32 %v666_v50, %v663_v49 }
 0x4f1   : > { %670 = vst.msk [vmem:[#allocation3] sm:$0xff] %vm669_vm4, %v668_v51 }
 0x506   : > { %v680_v56 = vpop.permute.xlu1 %679 }
 0x507   : > { %v682_v59 = vmul.f32 %v680_v56, %v635_v33  ;;  %v688_v60 = vmul.f32 %v687_v53, %v680_v56 }
 0x508   : > { %695 = sbr.rel (%p928_p8) target bundleno = 1701 (0x6a5), region = 56 }
 0x509   : > { %v683_v61 = vadd.f32 %v682_v59, %v677_v57  ;;  %v689_v62 = vadd.f32 %v688_v60, %v686_v58 }
 0x50b   : > { %684 = vst.msk [vmem:[#allocation4] sm:$0xff] %vm560_vm1, %v683_v61 }
 0x50c   : > { %690 = vst.msk [vmem:[#allocation5] sm:$0xff] %vm560_vm1, %v689_v62 }
 0x50d   : > { %v696_v63 = vld [vmem:[#allocation3] sm:$0xff]  ;;  %v1058_v1 = vmov 0   ;;  %v723_v12 = vld [vmem:[%s1253_s5] sm:$0xff]  ;;  %v726_v13 = vld [vmem:[%s1253_s5 + $0x18] sm:$0xff] }
 0x50e   : > { %v724_v0 = vld [vmem:[%s1253_s5 + $0x8] sm:$0xff]  ;;  %1004 = vset.pattern.permute.xlu0 %v1058_v1  ;;  %1007 = vrcp.f32 %v696_v63  ;;  %v708_v4 = vand.u32 2147483648, %v696_v63  ;;  %vm702_vm5 = vweird.f32 %v696_v63  ;;  %v706_v6 = vand.u32 2147483647, %v696_v63  ;;  %v725_v14 = vld [vmem:[%s1253_s5 + $0x10] sm:$0xff]  ;;  %744 = vmatpush.msra.mxu0 %v726_v13  ;;  %v780_v23 = vld [vmem:[%s1254_s6 + $0x18] sm:$0xff] }
 0x50f   : > { %767 = vmatpush.msra.mxu1 %v724_v0  ;;  %798 = vmatpush.msra.mxu2 %v780_v23  ;;  %v779_v24 = vld [vmem:[%s1254_s6 + $0x10] sm:$0xff]  ;;  %v778_v25 = vld [vmem:[%s1254_s6 + $0x8] sm:$0xff]  ;;  %v777_v26 = vld [vmem:[%s1254_s6] sm:$0xff] }
 0x510   : > { %v709_v8 = vor.u32 1.1754944e-38, %v708_v4  ;;  %vm707_vm8 = vcmp.eq.f32.partialorder %v706_v6, 8.507059e+37  ;;  %745 = vmatpush.msra.mxu0 %v725_v14  ;;  %v1005_v27 = vld [vmem:[%s1253_s5 + $0x20] ss:$0 sm:$0xff] }
 0x511   : > { %768 = vmatpush.msra.mxu1 %v723_v12  ;;  %799 = vmatpush.msra.mxu2 %v779_v24  ;;  %v1006_v33 = vld [vmem:[%s1254_s6 + $0x20] ss:$0 sm:$0xff] }
 0x512   : > { %v711_v15 = vld [vmem:[#allocation4] sm:$0xff] }
 0x513   : > { %v718_v16 = vld [vmem:[#allocation5] sm:$0xff]  ;;  %800 = vmatpush.msra.mxu2 %v778_v25 }
 0x514   : > { %v1008_v2 = vpop.eup %1007 }
 0x515   : > { %v698_v3 = vmul.f32 %v1008_v2, %v696_v63  ;;  %vm703_vm6 = vweird.f32 %v1008_v2  ;;  %801 = vmatpush.msra.mxu2 %v777_v26 }
 0x516   : > { %vm704_vm7 = vmor %vm702_vm5, %vm703_vm6 }
 0x517   : > { %v699_v5 = vsub.f32 1.0, %v698_v3 }
 0x519   : > { %v700_v7 = vmul.f32 %v1008_v2, %v699_v5 }
 0x51b   : > { %v701_v9 = vadd.f32 %v1008_v2, %v700_v7 }
 0x51d   : > { %v705_v10 = vsel %vm704_vm7, %v1008_v2, %v701_v9 }
 0x51e   : > { %v710_v11 = vsel %vm707_vm8, %v709_v8, %v705_v10 }
 0x51f   : > { %714 = vperm.xlu0 %1004, %v710_v11  }
 0x591   : > { %v715_v17 = vpop.permute.xlu0 %714 }
 0x592   : > { %v717_v18 = vmul.f32 %v715_v17, %v711_v15  ;;  %v719_v19 = vmul.f32 %v718_v16, %v715_v17 }
 0x594   : > { %v720_v20 = vmul.f32 %v717_v18, %v717_v18  ;;  %930 = vmatmul.msk.f32.vlgmr.msra.gmra.mxu1 %vm560_vm1, %v717_v18 }
 0x596   : > { %v721_v21 = vsub.f32 %v719_v19, %v720_v20 }
 0x598   : > { %v722_v22 = vmax.f32 %v721_v21, 0.0 }
 0x59a   : > { %929 = vmatmul.msk.f32.vlgmr.msra.gmra.mxu0 %vm560_vm1, %v722_v22  ;;  %vm806_vm1 = vcmask 31744  }
 0x611   : > { %v770_v28 = vpop.f32.mrf.mxu1 }
 0x617   : > { %v747_v29 = vpop.f32.mrf.mxu0 }
 0x618   : > { %v771_v30 = vadd.f32 %v770_v28, %v747_v29 }
 0x61a   : > { %v775_v31 = vadd.f32 %v1005_v27, %v771_v30 }
 0x61c   : > { %v776_v32 = vmax.f32 %v775_v31, 0.0 }
 0x61e   : > { %931 = vmatmul.msk.f32.vlgmr.msra.gmra.mxu2 %vm583_vm2, %v776_v32 }
 0x6a1   : > { %v803_v34 = vpop.f32.mrf.mxu2 }
 0x6a2   : > { %v804_v35 = vadd.f32 %v1006_v33, %v803_v34 }
 0x6a4   : > { %807 = vst.msk [vmem:[%s1147_s22] sm:$0xff] %vm806_vm1, %v804_v35 }
 0x6a5 PF: > { %s17_s28 = sadd.s32 1, %s1047_s28   ;;  %s1256_s24 = smov %s1039_s26 }
 0x6a6   : > { %p14_p9 = scmp.ge.s32.totalorder %s17_s28, 8   ;;  %s1257_s25 = smov %s1043_s27 }
 0x6a7   : > { %s1258_s26 = smov %s1261_s29  ;;  %s1259_s27 = smov %s1265_s30 }
 0x6a8   :  { %16 = sbr.rel (!%p14_p9) target bundleno = 3 (0x3), region = 92 }

</bundles_post_ra>
